<compile_context>
chip_gen: v7x
topology: tpu7x:2x2x1
jax: 0.10.0
libtpu: 0.0.40
codegen_flags: <defaults>
</compile_context>

<pallas_src>
import functools
import math

import jax
import jax.numpy as jnp
from jax.experimental import pallas as pl
from jax.experimental.pallas import tpu as pltpu

_INV_SQRT2 = 1.0 / math.sqrt(2.0)
_SQRT_2_OVER_PI = math.sqrt(2.0 / math.pi)
_LANE = 128


# ----------------------------------------------------------------------------- helpers
def _round_up(x, m):
    return ((x + m - 1) // m) * m


def _row_multiple(*dtypes):
    """Minimum sublane multiple for row tiles given the dtypes tiled on rows."""
    m = 8
    for dt in dtypes:
        isz = jnp.dtype(dt).itemsize
        if isz >= 1:
            m = max(m, 8 * max(1, 4 // isz))
    return m


def _vmem_capacity_bytes():
    """Generation-aware VMEM capacity (128 MiB v5e/v6e, 64 MiB v7x)."""
    try:
        return int(pltpu.get_tpu_info().vmem_capacity_bytes)
    except Exception:
        return 64 * 1024 * 1024  # conservative default, safe on every generation


def _gelu_f32(h, approximate):
    if approximate:
        # tanh approximation runs on the EUP slot (nearly free next to the MXU)
        return 0.5 * h * (1.0 + jnp.tanh(_SQRT_2_OVER_PI * (h + 0.044715 * h * h * h)))
    # exact erf GELU: matches torch.nn.GELU() default
    return 0.5 * h * (1.0 + jax.lax.erf(h * _INV_SQRT2))


def _maybe_single_buffered_spec(shape):
    """Resident (grid-invariant) block: request single buffering if available."""
    idx = lambda i: (0, 0)
    if hasattr(pl, "Buffered"):
        try:
            return pl.BlockSpec(shape, idx, pipeline_mode=pl.Buffered(1))
        except TypeError:
            pass
    return pl.BlockSpec(shape, idx)


def _pick_tile(dim, target):
    """Largest multiple of 128 <= target that divides dim (dim is a 128-multiple)."""
    t = max(_LANE, (min(dim, target) // _LANE) * _LANE)
    while dim % t:
        t -= _LANE
    return t


# ----------------------------------------------------------------------------- kernels
def _fused_mlp_kernel(*refs, num_layers, compute_dtype, gelu_approximate):
    # refs: x_ref, (w0, b0), (w1, b1), ..., o_ref
    x_ref = refs[0]
    o_ref = refs[1 + 2 * num_layers]
    h = x_ref[...]
    for li in range(num_layers):
        w_ref = refs[1 + 2 * li]
        b_ref = refs[2 + 2 * li]
        a = h.astype(compute_dtype)                      # MXU-native operands (bf16 default)
        h = jnp.dot(a, w_ref[...], preferred_element_type=jnp.float32)
        h = h + b_ref[...].astype(jnp.float32)           # f32 bias add (broadcast over rows)
        if li < num_layers - 1:
            h = _gelu_f32(h, gelu_approximate)           # f32 activation (v5e-safe)
    o_ref[...] = h.astype(o_ref.dtype)


def _tiled_layer_kernel(x_ref, w_ref, b_ref, o_ref, acc_ref, *,
                        apply_gelu, compute_dtype, gelu_approximate):
    k = pl.program_id(2)

    @pl.when(k == 0)
    def _():
        acc_ref[...] = jnp.zeros_like(acc_ref)

    acc_ref[...] += jnp.dot(x_ref[...].astype(compute_dtype), w_ref[...],
                            preferred_element_type=jnp.float32)

    @pl.when(k == pl.num_programs(2) - 1)
    def _():
        h = acc_ref[...] + b_ref[...].astype(jnp.float32)
        if apply_gelu:
            h = _gelu_f32(h, gelu_approximate)
        o_ref[...] = h.astype(o_ref.dtype)


# ----------------------------------------------------------------------------- params
def init_mlps_params(key, in_features, hidden_features, out_features=None,
                     dtype=jnp.float32):
    """Parameter init mirroring nn.Linear default (uniform +-1/sqrt(fan_in))."""
    out_features = out_features or in_features
    dims = [in_features] + list(hidden_features) + [out_features]
    params = []
    for i in range(len(dims) - 1):
        fan_in, fan_out = dims[i], dims[i + 1]
        key, kw, kb = jax.random.split(key, 3)
        bound = 1.0 / math.sqrt(fan_in)
        w = jax.random.uniform(kw, (fan_in, fan_out), dtype, -bound, bound)  # (in, out)
        b = jax.random.uniform(kb, (fan_out,), dtype, -bound, bound)
        params.append((w, b))
    return params


def prepare_mlps_params(params, *, compute_dtype=jnp.bfloat16):
    """Pad + cast the parameters ONCE (hoisted out of the forward hot path).

    Weights: zero-padded to 128-multiples and cast to the MXU compute dtype.
    Biases:  kept in f32 (exact bias add, tiny).  Zero padding + GELU(0)=0 keeps
    the un-padded output slice exact.
    """
    prepared = []
    for (w, b) in params:
        k, m = w.shape
        kp, mp = _round_up(k, _LANE), _round_up(m, _LANE)
        wp = jnp.zeros((kp, mp), compute_dtype).at[:k, :m].set(w.astype(compute_dtype))
        bp = jnp.zeros((1, mp), jnp.float32).at[0, :m].set(b.astype(jnp.float32))
        prepared.append((wp, bp, k, m))
    return prepared


# ----------------------------------------------------------------------------- fallback
def _tiled_layer(h, w_p, b_p, *, apply_gelu, compute_dtype, out_dtype, tm,
                 vmem_limit, gelu_approximate):
    Mp, Kp = h.shape
    _, Np = w_p.shape
    tn = _pick_tile(Np, 512)
    tk = _pick_tile(Kp, 512)
    grid = (Mp // tm, Np // tn, Kp // tk)
    kernel = functools.partial(_tiled_layer_kernel, apply_gelu=apply_gelu,
                               compute_dtype=compute_dtype,
                               gelu_approximate=gelu_approximate)
    return pl.pallas_call(
        kernel,
        out_shape=jax.ShapeDtypeStruct((Mp, Np), out_dtype),
        grid_spec=pltpu.PrefetchScalarGridSpec(
            num_scalar_prefetch=0,
            grid=grid,
            in_specs=[pl.BlockSpec((tm, tk), lambda i, j, k: (i, k)),
                      pl.BlockSpec((tk, tn), lambda i, j, k: (k, j)),
                      pl.BlockSpec((1, tn), lambda i, j, k: (0, j))],
            out_specs=pl.BlockSpec((tm, tn), lambda i, j, k: (i, j)),
            scratch_shapes=[pltpu.VMEM((tm, tn), jnp.float32)]),
        compiler_params=pltpu.CompilerParams(
            dimension_semantics=("parallel", "parallel", "arbitrary"),
            vmem_limit_bytes=vmem_limit),
    )(h, w_p, b_p)


# ----------------------------------------------------------------------------- forward
def mlps_forward(x, prepared_params, hidden_features, *, tm=512,
                 gelu_approximate=False, force_tiled=False):
    """Forward of Mlps. x: (..., in_features). prepared_params from prepare_mlps_params."""
    if len(hidden_features) <= 0:
        return x  # direct_output=True branch (identity)
    # TODO(synk): dropout with drop > 0 not implemented (module default drop=0.0 -> identity).

    num_layers = len(prepared_params)
    in_features = prepared_params[0][2]
    out_features = prepared_params[-1][3]
    compute_dtype = prepared_params[0][0].dtype
    out_dtype = x.dtype

    orig_shape = x.shape
    assert orig_shape[-1] == in_features
    n = 1
    for s in orig_shape[:-1]:
        n *= s
    h = x.reshape(n, in_features)

    pdims = [prepared_params[0][0].shape[0]] + [p[0].shape[1] for p in prepared_params]
    row_mult = _row_multiple(x.dtype, out_dtype)

    # --- generation-aware VMEM budget ------------------------------------------------
    vmem_cap = _vmem_capacity_bytes()
    budget = int(0.80 * vmem_cap)   # ~102 MiB on v5e/v6e, ~51 MiB on v7x

    param_bytes = sum(int(p[0].size) * p[0].dtype.itemsize +
                      int(p[1].size) * p[1].dtype.itemsize for p in prepared_params)

    def _fused_est(tm_):
        io = (2 * tm_ * pdims[0] * jnp.dtype(x.dtype).itemsize +
              2 * tm_ * pdims[-1] * jnp.dtype(out_dtype).itemsize)   # double-buffered io tiles
        live = 3 * tm_ * max(pdims) * 4                              # f32 intermediates headroom
        return param_bytes + io + live

    # --- row tile: large, dtype-aware, >=2 grid steps (v7x megacore), fits VMEM ------
    n_rounded = _round_up(n, row_mult)
    tm_eff = min(tm, n_rounded)
    if n_rounded > row_mult:
        tm_eff = min(tm_eff, _round_up((n_rounded + 1) // 2, row_mult))
    tm_eff = max(row_mult, tm_eff)
    while _fused_est(tm_eff) > budget and tm_eff > row_mult:
        tm_eff = max(row_mult, _round_up(tm_eff // 2, row_mult))

    use_fused = (not force_tiled) and _fused_est(tm_eff) <= budget

    if use_fused:
        # ------------------------------- fused single pallas_call --------------------
        n_pad = _round_up(n, tm_eff)
        if n_pad == n and in_features == pdims[0]:
            x_p = h                                           # no wrapper copy when aligned
        else:
            x_p = jnp.zeros((n_pad, pdims[0]), h.dtype).at[:n, :in_features].set(h)

        flat_wb = []
        in_specs = [pl.BlockSpec((tm_eff, pdims[0]), lambda i: (i, 0))]
        for (wp, bp, _, _) in prepared_params:
            kp, mp = wp.shape
            in_specs.append(_maybe_single_buffered_spec((kp, mp)))   # resident W
            in_specs.append(_maybe_single_buffered_spec((1, mp)))    # resident b
            flat_wb += [wp, bp]
        out_spec = pl.BlockSpec((tm_eff, pdims[-1]), lambda i: (i, 0))

        kernel = functools.partial(_fused_mlp_kernel, num_layers=num_layers,
                                   compute_dtype=compute_dtype,
                                   gelu_approximate=gelu_approximate)
        call = functools.partial(
            pl.pallas_call, kernel,
            out_shape=jax.ShapeDtypeStruct((n_pad, pdims[-1]), out_dtype),
            compiler_params=pltpu.CompilerParams(
                dimension_semantics=("parallel",),
                vmem_limit_bytes=budget),
        )
        grid_spec = pltpu.PrefetchScalarGridSpec(
            num_scalar_prefetch=0, grid=(n_pad // tm_eff,),
            in_specs=in_specs, out_specs=out_spec)
        try:
            y_p = call(grid_spec=grid_spec)(x_p, *flat_wb)
        except Exception:
            # Retry with default (double-buffered) resident specs if single-buffering
            # is not supported by this jax/Mosaic version.
            in_specs_db = [pl.BlockSpec((tm_eff, pdims[0]), lambda i: (i, 0))]
            for (wp, bp, _, _) in prepared_params:
                kp, mp = wp.shape
                in_specs_db.append(pl.BlockSpec((kp, mp), lambda i: (0, 0)))
                in_specs_db.append(pl.BlockSpec((1, mp), lambda i: (0, 0)))
            grid_spec = pltpu.PrefetchScalarGridSpec(
                num_scalar_prefetch=0, grid=(n_pad // tm_eff,),
                in_specs=in_specs_db, out_specs=out_spec)
            y_p = call(grid_spec=grid_spec)(x_p, *flat_wb)

        y = y_p if (n_pad == n and out_features == pdims[-1]) else y_p[:n, :out_features]
    else:
        # ------------------------------- tiled per-layer fallback --------------------
        # Weights too big for VMEM residency: (M,N,K)-tiled matmul per layer with an
        # f32 VMEM accumulator and a fused bias+GELU epilogue.
        tm_t = min(256, _round_up(n, row_mult))
        Mp = _round_up(n, tm_t)
        if Mp == n and in_features == pdims[0]:
            h_p = h
        else:
            h_p = jnp.zeros((Mp, pdims[0]), h.dtype).at[:n, :in_features].set(h)
        for li, (wp, bp, _, _) in enumerate(prepared_params):
            last = li == num_layers - 1
            h_p = _tiled_layer(h_p, wp, bp,
                               apply_gelu=not last,
                               compute_dtype=compute_dtype,
                               out_dtype=out_dtype if last else jnp.float32,
                               tm=tm_t, vmem_limit=budget,
                               gelu_approximate=gelu_approximate)
        y = h_p if (Mp == n and out_features == pdims[-1]) else h_p[:n, :out_features]

    return y.reshape(orig_shape[:-1] + (out_features,))


# ----------------------------------------------------------------------------- reference
def mlps_reference(x, params, hidden_features):
    """Pure-JAX f32 reference (matches the PyTorch module)."""
    if len(hidden_features) <= 0:
        return x
    h = x
    for li, (w, b) in enumerate(params):
        h = h @ w + b
        if li < len(params) - 1:
            h = 0.5 * h * (1.0 + jax.lax.erf(h * _INV_SQRT2))
    return h


# ----------------------------------------------------------------------------- test
if __name__ == "__main__":
    key = jax.random.PRNGKey(0)

    # Small shapes: batch=2, seq=8, in_features=32, hidden=[64, 48], out=32
    batch, seq = 2, 8
    in_features = 32
    hidden_features = [64, 48]
    out_features = 32

    key, kx, kp = jax.random.split(key, 3)
    x = jax.random.normal(kx, (batch, seq, in_features), dtype=jnp.float32)
    params = init_mlps_params(kp, in_features, hidden_features, out_features)
    y_ref = mlps_reference(x, params, hidden_features)

    # 1) Fused path, f32 compute: bit-tight parity with the f32 reference.
    prep_f32 = prepare_mlps_params(params, compute_dtype=jnp.float32)
    y_f32 = jax.block_until_ready(mlps_forward(x, prep_f32, hidden_features))
    assert y_f32.shape == (batch, seq, out_features)
    assert jnp.allclose(y_f32, y_ref, atol=1e-5, rtol=1e-5), "f32 fused mismatch"

    # 2) Fused path, bf16 MXU operands (default fast path): small numeric delta expected.
    prep_bf16 = prepare_mlps_params(params, compute_dtype=jnp.bfloat16)
    y_bf16 = jax.block_until_ready(mlps_forward(x, prep_bf16, hidden_features))
    assert jnp.allclose(y_bf16, y_ref, atol=2e-2, rtol=2e-2), "bf16 fused mismatch"

    # 3) Padded-tail path: row count not a multiple of the sublane multiple.
    key, kx2 = jax.random.split(key)
    x2 = jax.random.normal(kx2, (3, 5, in_features), dtype=jnp.float32)
    y2 = jax.block_until_ready(mlps_forward(x2, prep_bf16, hidden_features))
    y2_ref = mlps_reference(x2, params, hidden_features)
    assert y2.shape == (3, 5, out_features)
    assert jnp.allclose(y2, y2_ref, atol=2e-2, rtol=2e-2), "bf16 fused mismatch (padded tail)"

    # 4) Tiled fallback path (used when weights don't fit VMEM residency) — forced here.
    y_tiled = jax.block_until_ready(
        mlps_forward(x, prep_f32, hidden_features, force_tiled=True))
    assert jnp.allclose(y_tiled, y_ref, atol=1e-5, rtol=1e-5), "tiled fallback mismatch"

    # 5) direct_output (identity) path.
    y_id = jax.block_until_ready(mlps_forward(x, [], []))
    assert jnp.array_equal(y_id, x)

    print("KERNEL_OK")
</pallas_src>

<mosaic_0001>
module attributes {stable_mosaic.version = 11 : i64} {
  func.func @_fused_mlp_kernel(%arg0: i32, %arg1: memref<8x128xf32, #tpu.memory_space<vmem>>, %arg2: memref<128x128xf32, #tpu.memory_space<vmem>>, %arg3: memref<1x128xf32, #tpu.memory_space<vmem>>, %arg4: memref<128x128xf32, #tpu.memory_space<vmem>>, %arg5: memref<1x128xf32, #tpu.memory_space<vmem>>, %arg6: memref<128x128xf32, #tpu.memory_space<vmem>>, %arg7: memref<1x128xf32, #tpu.memory_space<vmem>>, %arg8: memref<8x128xf32, #tpu.memory_space<vmem>>) attributes {dimension_semantics = [#tpu.dimension_semantics<parallel>], iteration_bounds = array<i64: 2>, scalar_prefetch = 0 : i64, scratch_operands = 0 : i64, tpu.core_type = #tpu.core_type<tc>, window_params = [{transform_indices = @transform_0, window_bounds = array<i64: 8, 128>}, {pipeline_mode = #tpu.pipeline_mode<synchronous>, transform_indices = @transform_1, window_bounds = array<i64: 128, 128>}, {pipeline_mode = #tpu.pipeline_mode<synchronous>, transform_indices = @transform_2, window_bounds = array<i64: 1, 128>}, {pipeline_mode = #tpu.pipeline_mode<synchronous>, transform_indices = @transform_3, window_bounds = array<i64: 128, 128>}, {pipeline_mode = #tpu.pipeline_mode<synchronous>, transform_indices = @transform_4, window_bounds = array<i64: 1, 128>}, {pipeline_mode = #tpu.pipeline_mode<synchronous>, transform_indices = @transform_5, window_bounds = array<i64: 128, 128>}, {pipeline_mode = #tpu.pipeline_mode<synchronous>, transform_indices = @transform_6, window_bounds = array<i64: 1, 128>}, {transform_indices = @transform_7, window_bounds = array<i64: 8, 128>}]} {
    %c0 = arith.constant 0 : index
    %c0_0 = arith.constant 0 : index
    %0 = vector.load %arg1[%c0, %c0_0] : memref<8x128xf32, #tpu.memory_space<vmem>>, vector<8x128xf32>
    %c0_1 = arith.constant 0 : index
    %c0_2 = arith.constant 0 : index
    %1 = vector.load %arg2[%c0_1, %c0_2] : memref<128x128xf32, #tpu.memory_space<vmem>>, vector<128x128xf32>
    %cst = arith.constant dense<0.000000e+00> : vector<8x128xf32>
    %2 = tpu.matmul %0, %1, %cst {dimension_numbers = #tpu.dot_dimension_numbers<[1], [0], [0], [1], [0, 0, 1, 1], [], []>} : vector<8x128xf32>, vector<128x128xf32>, vector<8x128xf32> -> vector<8x128xf32>
    %c0_3 = arith.constant 0 : index
    %c0_4 = arith.constant 0 : index
    %3 = vector.load %arg3[%c0_3, %c0_4] : memref<1x128xf32, #tpu.memory_space<vmem>>, vector<1x128xf32>
    %4 = vector.broadcast %3 : vector<1x128xf32> to vector<8x128xf32>
    %5 = arith.addf %2, %4 : vector<8x128xf32>
    %cst_5 = arith.constant 5.000000e-01 : f32
    %6 = vector.broadcast %cst_5 : f32 to vector<8x128xf32>
    %7 = arith.mulf %6, %5 : vector<8x128xf32>
    %cst_6 = arith.constant 0.707106769 : f32
    %8 = vector.broadcast %cst_6 : f32 to vector<8x128xf32>
    %9 = arith.mulf %5, %8 : vector<8x128xf32>
    %10 = math.erf %9 : vector<8x128xf32>
    %cst_7 = arith.constant 1.000000e+00 : f32
    %11 = vector.broadcast %cst_7 : f32 to vector<8x128xf32>
    %12 = arith.addf %11, %10 : vector<8x128xf32>
    %13 = arith.mulf %7, %12 : vector<8x128xf32>
    %c0_8 = arith.constant 0 : index
    %c0_9 = arith.constant 0 : index
    %14 = vector.load %arg4[%c0_8, %c0_9] : memref<128x128xf32, #tpu.memory_space<vmem>>, vector<128x128xf32>
    %cst_10 = arith.constant dense<0.000000e+00> : vector<8x128xf32>
    %15 = tpu.matmul %13, %14, %cst_10 {dimension_numbers = #tpu.dot_dimension_numbers<[1], [0], [0], [1], [0, 0, 1, 1], [], []>} : vector<8x128xf32>, vector<128x128xf32>, vector<8x128xf32> -> vector<8x128xf32>
    %c0_11 = arith.constant 0 : index
    %c0_12 = arith.constant 0 : index
    %16 = vector.load %arg5[%c0_11, %c0_12] : memref<1x128xf32, #tpu.memory_space<vmem>>, vector<1x128xf32>
    %17 = vector.broadcast %16 : vector<1x128xf32> to vector<8x128xf32>
    %18 = arith.addf %15, %17 : vector<8x128xf32>
    %cst_13 = arith.constant 5.000000e-01 : f32
    %19 = vector.broadcast %cst_13 : f32 to vector<8x128xf32>
    %20 = arith.mulf %19, %18 : vector<8x128xf32>
    %cst_14 = arith.constant 0.707106769 : f32
    %21 = vector.broadcast %cst_14 : f32 to vector<8x128xf32>
    %22 = arith.mulf %18, %21 : vector<8x128xf32>
    %23 = math.erf %22 : vector<8x128xf32>
    %cst_15 = arith.constant 1.000000e+00 : f32
    %24 = vector.broadcast %cst_15 : f32 to vector<8x128xf32>
    %25 = arith.addf %24, %23 : vector<8x128xf32>
    %26 = arith.mulf %20, %25 : vector<8x128xf32>
    %c0_16 = arith.constant 0 : index
    %c0_17 = arith.constant 0 : index
    %27 = vector.load %arg6[%c0_16, %c0_17] : memref<128x128xf32, #tpu.memory_space<vmem>>, vector<128x128xf32>
    %cst_18 = arith.constant dense<0.000000e+00> : vector<8x128xf32>
    %28 = tpu.matmul %26, %27, %cst_18 {dimension_numbers = #tpu.dot_dimension_numbers<[1], [0], [0], [1], [0, 0, 1, 1], [], []>} : vector<8x128xf32>, vector<128x128xf32>, vector<8x128xf32> -> vector<8x128xf32>
    %c0_19 = arith.constant 0 : index
    %c0_20 = arith.constant 0 : index
    %29 = vector.load %arg7[%c0_19, %c0_20] : memref<1x128xf32, #tpu.memory_space<vmem>>, vector<1x128xf32>
    %30 = vector.broadcast %29 : vector<1x128xf32> to vector<8x128xf32>
    %31 = arith.addf %28, %30 : vector<8x128xf32>
    %c0_21 = arith.constant 0 : index
    %c0_22 = arith.constant 0 : index
    %32 = vector.load %arg8[%c0_21, %c0_22] : memref<8x128xf32, #tpu.memory_space<vmem>>, vector<8x128xf32>
    tpu.vector_store %arg8[%c0_21, %c0_22], %31 {strides = array<i32>} : memref<8x128xf32, #tpu.memory_space<vmem>>, vector<8x128xf32>,
    return
  }
  func.func @transform_0(%arg0: i32) -> (i32, i32) {
    %c0_i32 = arith.constant 0 : i32
    %c0_i32_0 = arith.constant 0 : i32
    return %arg0, %c0_i32 : i32, i32
  }
  func.func @transform_1(%arg0: i32) -> (i32, i32) {
    %c0_i32 = arith.constant 0 : i32
    %c0_i32_0 = arith.constant 0 : i32
    %c0_i32_1 = arith.constant 0 : i32
    return %c0_i32, %c0_i32_0 : i32, i32
  }
  func.func @transform_2(%arg0: i32) -> (i32, i32) {
    %c0_i32 = arith.constant 0 : i32
    %c0_i32_0 = arith.constant 0 : i32
    %c0_i32_1 = arith.constant 0 : i32
    return %c0_i32, %c0_i32_0 : i32, i32
  }
  func.func @transform_3(%arg0: i32) -> (i32, i32) {
    %c0_i32 = arith.constant 0 : i32
    %c0_i32_0 = arith.constant 0 : i32
    %c0_i32_1 = arith.constant 0 : i32
    return %c0_i32, %c0_i32_0 : i32, i32
  }
  func.func @transform_4(%arg0: i32) -> (i32, i32) {
    %c0_i32 = arith.constant 0 : i32
    %c0_i32_0 = arith.constant 0 : i32
    %c0_i32_1 = arith.constant 0 : i32
    return %c0_i32, %c0_i32_0 : i32, i32
  }
  func.func @transform_5(%arg0: i32) -> (i32, i32) {
    %c0_i32 = arith.constant 0 : i32
    %c0_i32_0 = arith.constant 0 : i32
    %c0_i32_1 = arith.constant 0 : i32
    return %c0_i32, %c0_i32_0 : i32, i32
  }
  func.func @transform_6(%arg0: i32) -> (i32, i32) {
    %c0_i32 = arith.constant 0 : i32
    %c0_i32_0 = arith.constant 0 : i32
    %c0_i32_1 = arith.constant 0 : i32
    return %c0_i32, %c0_i32_0 : i32, i32
  }
  func.func @transform_7(%arg0: i32) -> (i32, i32) {
    %c0_i32 = arith.constant 0 : i32
    %c0_i32_0 = arith.constant 0 : i32
    return %arg0, %c0_i32 : i32, i32
  }
}

module attributes {stable_mosaic.version = 11 : i64} {
  func.func @_fused_mlp_kernel(%arg0: i32, %arg1: memref<8x128xf32, #tpu.memory_space<vmem>>, %arg2: memref<128x128xf32, #tpu.memory_space<vmem>>, %arg3: memref<1x128xf32, #tpu.memory_space<vmem>>, %arg4: memref<128x128xf32, #tpu.memory_space<vmem>>, %arg5: memref<1x128xf32, #tpu.memory_space<vmem>>, %arg6: memref<128x128xf32, #tpu.memory_space<vmem>>, %arg7: memref<1x128xf32, #tpu.memory_space<vmem>>, %arg8: memref<8x128xf32, #tpu.memory_space<vmem>>) attributes {dimension_semantics = [#tpu.dimension_semantics<parallel>], iteration_bounds = array<i64: 2>, scalar_prefetch = 0 : i64, scratch_operands = 0 : i64, tpu.core_type = #tpu.core_type<tc>, window_params = [{transform_indices = @transform_0, window_bounds = array<i64: 8, 128>}, {pipeline_mode = #tpu.pipeline_mode<synchronous>, transform_indices = @transform_1, window_bounds = array<i64: 128, 128>}, {pipeline_mode = #tpu.pipeline_mode<synchronous>, transform_indices = @transform_2, window_bounds = array<i64: 1, 128>}, {pipeline_mode = #tpu.pipeline_mode<synchronous>, transform_indices = @transform_3, window_bounds = array<i64: 128, 128>}, {pipeline_mode = #tpu.pipeline_mode<synchronous>, transform_indices = @transform_4, window_bounds = array<i64: 1, 128>}, {pipeline_mode = #tpu.pipeline_mode<synchronous>, transform_indices = @transform_5, window_bounds = array<i64: 128, 128>}, {pipeline_mode = #tpu.pipeline_mode<synchronous>, transform_indices = @transform_6, window_bounds = array<i64: 1, 128>}, {transform_indices = @transform_7, window_bounds = array<i64: 8, 128>}]} {
    %c0 = arith.constant 0 : index
    %c0_0 = arith.constant 0 : index
    %0 = vector.load %arg1[%c0, %c0_0] : memref<8x128xf32, #tpu.memory_space<vmem>>, vector<8x128xf32>
    %c0_1 = arith.constant 0 : index
    %c0_2 = arith.constant 0 : index
    %1 = vector.load %arg2[%c0_1, %c0_2] : memref<128x128xf32, #tpu.memory_space<vmem>>, vector<128x128xf32>
    %cst = arith.constant dense<0.000000e+00> : vector<8x128xf32>
    %2 = tpu.matmul %0, %1, %cst {dimension_numbers = #tpu.dot_dimension_numbers<[1], [0], [0], [1], [0, 0, 1, 1], [], []>} : vector<8x128xf32>, vector<128x128xf32>, vector<8x128xf32> -> vector<8x128xf32>
    %c0_3 = arith.constant 0 : index
    %c0_4 = arith.constant 0 : index
    %3 = vector.load %arg3[%c0_3, %c0_4] : memref<1x128xf32, #tpu.memory_space<vmem>>, vector<1x128xf32>
    %4 = vector.broadcast %3 : vector<1x128xf32> to vector<8x128xf32>
    %5 = arith.addf %2, %4 : vector<8x128xf32>
    %cst_5 = arith.constant 5.000000e-01 : f32
    %6 = vector.broadcast %cst_5 : f32 to vector<8x128xf32>
    %7 = arith.mulf %6, %5 : vector<8x128xf32>
    %cst_6 = arith.constant 0.707106769 : f32
    %8 = vector.broadcast %cst_6 : f32 to vector<8x128xf32>
    %9 = arith.mulf %5, %8 : vector<8x128xf32>
    %10 = math.erf %9 : vector<8x128xf32>
    %cst_7 = arith.constant 1.000000e+00 : f32
    %11 = vector.broadcast %cst_7 : f32 to vector<8x128xf32>
    %12 = arith.addf %11, %10 : vector<8x128xf32>
    %13 = arith.mulf %7, %12 : vector<8x128xf32>
    %c0_8 = arith.constant 0 : index
    %c0_9 = arith.constant 0 : index
    %14 = vector.load %arg4[%c0_8, %c0_9] : memref<128x128xf32, #tpu.memory_space<vmem>>, vector<128x128xf32>
    %cst_10 = arith.constant dense<0.000000e+00> : vector<8x128xf32>
    %15 = tpu.matmul %13, %14, %cst_10 {dimension_numbers = #tpu.dot_dimension_numbers<[1], [0], [0], [1], [0, 0, 1, 1], [], []>} : vector<8x128xf32>, vector<128x128xf32>, vector<8x128xf32> -> vector<8x128xf32>
    %c0_11 = arith.constant 0 : index
    %c0_12 = arith.constant 0 : index
    %16 = vector.load %arg5[%c0_11, %c0_12] : memref<1x128xf32, #tpu.memory_space<vmem>>, vector<1x128xf32>
    %17 = vector.broadcast %16 : vector<1x128xf32> to vector<8x128xf32>
    %18 = arith.addf %15, %17 : vector<8x128xf32>
    %cst_13 = arith.constant 5.000000e-01 : f32
    %19 = vector.broadcast %cst_13 : f32 to vector<8x128xf32>
    %20 = arith.mulf %19, %18 : vector<8x128xf32>
    %cst_14 = arith.constant 0.707106769 : f32
    %21 = vector.broadcast %cst_14 : f32 to vector<8x128xf32>
    %22 = arith.mulf %18, %21 : vector<8x128xf32>
    %23 = math.erf %22 : vector<8x128xf32>
    %cst_15 = arith.constant 1.000000e+00 : f32
    %24 = vector.broadcast %cst_15 : f32 to vector<8x128xf32>
    %25 = arith.addf %24, %23 : vector<8x128xf32>
    %26 = arith.mulf %20, %25 : vector<8x128xf32>
    %c0_16 = arith.constant 0 : index
    %c0_17 = arith.constant 0 : index
    %27 = vector.load %arg6[%c0_16, %c0_17] : memref<128x128xf32, #tpu.memory_space<vmem>>, vector<128x128xf32>
    %cst_18 = arith.constant dense<0.000000e+00> : vector<8x128xf32>
    %28 = tpu.matmul %26, %27, %cst_18 {dimension_numbers = #tpu.dot_dimension_numbers<[1], [0], [0], [1], [0, 0, 1, 1], [], []>} : vector<8x128xf32>, vector<128x128xf32>, vector<8x128xf32> -> vector<8x128xf32>
    %c0_19 = arith.constant 0 : index
    %c0_20 = arith.constant 0 : index
    %29 = vector.load %arg7[%c0_19, %c0_20] : memref<1x128xf32, #tpu.memory_space<vmem>>, vector<1x128xf32>
    %30 = vector.broadcast %29 : vector<1x128xf32> to vector<8x128xf32>
    %31 = arith.addf %28, %30 : vector<8x128xf32>
    %c0_21 = arith.constant 0 : index
    %c0_22 = arith.constant 0 : index
    %32 = vector.load %arg8[%c0_21, %c0_22] : memref<8x128xf32, #tpu.memory_space<vmem>>, vector<8x128xf32>
    tpu.vector_store %arg8[%c0_21, %c0_22], %31 {strides = array<i32>} : memref<8x128xf32, #tpu.memory_space<vmem>>, vector<8x128xf32>,
    return
  }
  func.func @transform_0(%arg0: i32) -> (i32, i32) {
    %c0_i32 = arith.constant 0 : i32
    %c0_i32_0 = arith.constant 0 : i32
    return %arg0, %c0_i32 : i32, i32
  }
  func.func @transform_1(%arg0: i32) -> (i32, i32) {
    %c0_i32 = arith.constant 0 : i32
    %c0_i32_0 = arith.constant 0 : i32
    %c0_i32_1 = arith.constant 0 : i32
    return %c0_i32, %c0_i32_0 : i32, i32
  }
  func.func @transform_2(%arg0: i32) -> (i32, i32) {
    %c0_i32 = arith.constant 0 : i32
    %c0_i32_0 = arith.constant 0 : i32
    %c0_i32_1 = arith.constant 0 : i32
    return %c0_i32, %c0_i32_0 : i32, i32
  }
  func.func @transform_3(%arg0: i32) -> (i32, i32) {
    %c0_i32 = arith.constant 0 : i32
    %c0_i32_0 = arith.constant 0 : i32
    %c0_i32_1 = arith.constant 0 : i32
    return %c0_i32, %c0_i32_0 : i32, i32
  }
  func.func @transform_4(%arg0: i32) -> (i32, i32) {
    %c0_i32 = arith.constant 0 : i32
    %c0_i32_0 = arith.constant 0 : i32
    %c0_i32_1 = arith.constant 0 : i32
    return %c0_i32, %c0_i32_0 : i32, i32
  }
  func.func @transform_5(%arg0: i32) -> (i32, i32) {
    %c0_i32 = arith.constant 0 : i32
    %c0_i32_0 = arith.constant 0 : i32
    %c0_i32_1 = arith.constant 0 : i32
    return %c0_i32, %c0_i32_0 : i32, i32
  }
  func.func @transform_6(%arg0: i32) -> (i32, i32) {
    %c0_i32 = arith.constant 0 : i32
    %c0_i32_0 = arith.constant 0 : i32
    %c0_i32_1 = arith.constant 0 : i32
    return %c0_i32, %c0_i32_0 : i32, i32
  }
  func.func @transform_7(%arg0: i32) -> (i32, i32) {
    %c0_i32 = arith.constant 0 : i32
    %c0_i32_0 = arith.constant 0 : i32
    return %arg0, %c0_i32 : i32, i32
  }
}

</mosaic_0001>

<bundles_post_ra>
// kernel: tpu_custom_call.1
= control target key start
LH: loop header
LB: loop body
LE: loop exit
PB: predicated region body
PF: predicated region fallthrough
CT: control target
= control target key end

     0   :  { %12 = vsyncpa [#allocation3], 0  ;;  %s1623_s0 = inlined_call_operand.hbm [shape: f32[16,128], index: 0, kind: input, shape index: {}]   ;;  %s1624_s1 = inlined_call_operand.hbm [shape: f32[128,128], index: 1, kind: input, shape index: {}]   ;;  %s1625_s2 = inlined_call_operand.vmem [shape: f32[1,128], index: 2, kind: input, shape index: {}]   ;;  %s1626_s3 = inlined_call_operand.hbm [shape: f32[128,128], index: 3, kind: input, shape index: {}]   ;;  %s1627_s4 = inlined_call_operand.vmem [shape: f32[1,128], index: 4, kind: input, shape index: {}]   ;;  %s1628_s5 = inlined_call_operand.hbm [shape: f32[128,128], index: 5, kind: input, shape index: {}]   ;;  %s1629_s6 = inlined_call_operand.vmem [shape: f32[1,128], index: 6, kind: input, shape index: {}]   ;;  %s1630_s7 = inlined_call_operand.hbm [shape: f32[16,128], index: 7, kind: output, shape index: {}]  }
   0x1   :  { %14 = vsyncpa [#allocation3 + $0x1], 0 }
   0x2   :  { %15 = vsyncpa [#allocation6], 0 }
   0x3   :  { %16 = vsyncpa [#allocation9], 0 }
   0x4   :  { %17 = vsyncpa [#allocation4], 0 }
   0x5   :  { %19 = vsyncpa [#allocation4 + $0x1], 0  ;;  %s1317_s24 = smov 0   ;;  %s1319_s25 = smov 0  }
   0x6   :  { %s1321_s26 = smov 0   ;;  %s1323_s27 = smov 0  }
   0x7 LB: > { %s1338_s28 = sadd.s32 4294967295, %s1265_s27   ;;  %s742_s29 = sadd.s32 4294967294, %s1265_s27   ;;  %s1265_s27 = sphi %s1323_s27, %s1656_s27   ;;  %s1261_s26 = sphi %s1321_s26, %s1655_s26   ;;  %s1257_s25 = sphi %s1319_s25, %s1654_s25   ;;  %s1253_s24 = sphi %s1317_s24, %s1653_s24  }
   0x8   : > { %p45_p0 = scmp.ne.s32.totalorder %s1257_s25, %s1253_s24  ;;  %p1631_p1 = scmp.eq.s32.totalorder %s1338_s28, 0 }
   0x9   : > { %p201_p3 = scmp.eq.s32.totalorder %s742_s29, 1  ;;  %p743_p5 = scmp.ge.s32.totalorder %s1265_s27, 1 }
   0xa   : > { %p1347_p4 = por %p1631_p1, %p45_p0  ;;  %p208_p7 = scmp.lt.s32.totalorder %s1265_s27, 3 }
   0xb   : > { %p1352_p6 = por %p201_p3, %p45_p0  ;;  %s1267_s10 = smov [#allocation5]  }
   0xc   : > { %s1635_s30 = scalar_select %p1347_p4, 1, 0 }
   0xd   : > { %s1636_s8 = scalar_select %p1352_p6, 1, 0 }
   0xe   : > { %p1357_p8 = pnand %p743_p5, %p208_p7  ;;  %s220_s11 = sshll.u32 %s1267_s10, 4  ;;  %s1361_s11 = int_to_ptr.vmem [resolvable:$true] %s220_s11 }
   0xf   : > { %1637 = sst [smem:[#allocation15_spill]] %s1636_s8  ;;  %s1268_s13 = smov [#allocation7]  }
  0x10   : > { %s1638_s9 = scalar_select %p1357_p8, 1, 0 }
  0x11   : > { %p1007_p9 = pneg %p1357_p8  ;;  %s236_s14 = sshll.u32 %s1268_s13, 4  ;;  %s1372_s14 = int_to_ptr.vmem [resolvable:$true] %s236_s14 }
  0x12   : > { %s1269_s15 = smov [#allocation8]   ;;  %s1077_s19 = scalar_lea.hbm %s1624_s1, 2048 }
  0x13   : > { %p1368_p11 = pnand %p1007_p9, %p1631_p1  ;;  %s1374_s16 = sshll.u32 %s1269_s15, 4  ;;  %s253_s16 = int_to_ptr.vmem [resolvable:$true] %s1374_s16 }
  0x14   : > { %p1078_p12 = scmp.ne.s32.totalorder %s1624_s1, %s1077_s19  ;;  %p1084_p5 = scmp.lt.u32.totalorder %s1077_s19, %s1624_s1 }
  0x15   : > { %p1384_p13 = pneg %p1368_p11 }
  0x17   : > { %p1080_p0 = pnand %p1384_p13, %p1078_p12 }
  0x19   : > { %p1081_p3 = pneg %p1080_p0 }
  0x1b   : > { %p1086_p7 = pnand %p1084_p5, %p1081_p3 }
  0x1d   : > { %1089 = shalt.err (!%p1086_p7)
}
  0x1e   : > { %s1090_s10 = scalar_lea.vmem %s1361_s11, 2048  ;;  %p1098_p2 = scmp.lt.s32.totalorder %s1361_s11, %s1361_s11 }
  0x1f   : > { %p1091_p9 = scmp.ne.s32.totalorder %s1361_s11, %s1090_s10  ;;  %p1099_p6 = scmp.lt.s32.totalorder %s1090_s10, %s1090_s10 }
  0x21   : > { %p1093_p10 = pnand %p1091_p9, %p1384_p13  ;;  %p1100_p12 = por %p1099_p6, %p1098_p2 }
  0x23   : > { %p1094_p1 = pneg %p1093_p10 }
  0x25   : > { %p1101_p0 = pnand %p1100_p12, %p1094_p1 }
  0x27   : > { %1104 = shalt.err (!%p1101_p0)
}
  0x28   : > { %s1270_s13 = smov 128   ;;  %s1271_s15 = smov 8  }
  0x29   : > { %1010 = dma.hbm_to_vmem [thread:$0]  (!%p1368_p11), %s1624_s1, 2048, %s1361_s11, [#allocation6], %s1270_s13, %s1270_s13, %s1271_s15  }
  0x2a   : > { %s1105_s21 = scalar_lea.hbm %s1626_s3, 2048 }
  0x2b   : > { %p1106_p1 = scmp.ne.s32.totalorder %s1626_s3, %s1105_s21  ;;  %p1112_p10 = scmp.lt.u32.totalorder %s1105_s21, %s1626_s3 }
  0x2d   : > { %p1108_p2 = pnand %p1106_p1, %p1384_p13 }
  0x2f   : > { %p1109_p6 = pneg %p1108_p2 }
  0x31   : > { %p1114_p3 = pnand %p1112_p10, %p1109_p6 }
  0x33   : > { %1117 = shalt.err (!%p1114_p3)
}
  0x34   : > { %s1118_s11 = scalar_lea.vmem %s1372_s14, 2048  ;;  %p1126_p12 = scmp.lt.s32.totalorder %s1372_s14, %s1372_s14 }
  0x35   : > { %p1119_p5 = scmp.ne.s32.totalorder %s1372_s14, %s1118_s11  ;;  %p1127_p0 = scmp.lt.s32.totalorder %s1118_s11, %s1118_s11 }
  0x37   : > { %p1121_p7 = pnand %p1119_p5, %p1384_p13  ;;  %p1128_p1 = por %p1127_p0, %p1126_p12 }
  0x39   : > { %p1122_p9 = pneg %p1121_p7 }
  0x3b   : > { %p1129_p2 = pnand %p1128_p1, %p1122_p9 }
  0x3d   : > { %1132 = shalt.err (!%p1129_p2)
}
  0x3e   : > { %1013 = dma.hbm_to_vmem [thread:$0]  (!%p1368_p11), %s1626_s3, 2048, %s1372_s14, [#allocation6], %s1270_s13, %s1270_s13, %s1271_s15  }
  0x3f   : > { %s1133_s20 = scalar_lea.hbm %s1628_s5, 2048 }
  0x40   : > { %p1134_p6 = scmp.ne.s32.totalorder %s1628_s5, %s1133_s20  ;;  %p1140_p5 = scmp.lt.u32.totalorder %s1133_s20, %s1628_s5 }
  0x42   : > { %p1136_p10 = pnand %p1134_p6, %p1384_p13 }
  0x44   : > { %p1137_p3 = pneg %p1136_p10 }
  0x46   : > { %p1142_p7 = pnand %p1140_p5, %p1137_p3 }
  0x48   : > { %1145 = shalt.err (!%p1142_p7)
}
  0x49   : > { %s1146_s11 = scalar_lea.vmem %s253_s16, 2048  ;;  %p1154_p1 = scmp.lt.s32.totalorder %s253_s16, %s253_s16 }
  0x4a   : > { %p1147_p9 = scmp.ne.s32.totalorder %s253_s16, %s1146_s11  ;;  %p1155_p2 = scmp.lt.s32.totalorder %s1146_s11, %s1146_s11 }
  0x4c   : > { %p1149_p12 = pnand %p1147_p9, %p1384_p13  ;;  %p1156_p4 = por %p1155_p2, %p1154_p1 }
  0x4e   : > { %p1150_p0 = pneg %p1149_p12 }
  0x50   : > { %p1157_p8 = pnand %p1156_p4, %p1150_p0 }
  0x52   : > { %1160 = shalt.err (!%p1157_p8)
}
  0x53   : > { %1016 = dma.hbm_to_vmem [thread:$0]  (!%p1368_p11), %s1628_s5, 2048, %s253_s16, [#allocation9], %s1270_s13, %s1270_s13, %s1271_s15  }
  0x54   : > { %s1457_s22 = sadd.s32 1, %s1265_s27   ;;  %s32_s17 = sadd.s32 1, %s1261_s26 }
  0x55   : > { %s29_s12 = ssub.s32 %s1265_s27, %s1457_s22  ;;  %p39_p8 = scmp.ne.s32.totalorder %s1261_s26, %s1257_s25 }
  0x56   : > { %p30_p4 = scmp.eq.s32.totalorder %s29_s12, 0  ;;  %p40_p13 = scmp.eq.s32.totalorder %s1265_s27, 0 }
  0x57   : > { %p1028_p6 = scmp.lt.s32.totalorder %s1265_s27, 2  ;;  %p1641_p3 = scmp.eq.s32.totalorder %s1338_s28, 1 }
  0x58   : > { %s1467_s18 = scalar_select %p30_p4, %s1261_s26, %s32_s17  }
  0x59   : > { %p41_p10 = por %p40_p13, %p39_p8  ;;  %p1471_p5 = por %p1641_p3, %p39_p8 }
  0x5a   : > { %s269_s20 = sand.u32 1, %s1261_s26   ;;  %s749_s21 = sshll.u32 %s1265_s27, 7 }
  0x5b   : > { %s748_s16 = sshll.u32 %s269_s20, 3  ;;  %s1480_s23 = scalar_lea.hbm %s1623_s0, %s749_s21 }
  0x5c   : > { %s273_s29 = scalar_lea.vmem [#allocation2], %s748_s16  ;;  %p1482_p11 = pnand %p1028_p6, %p41_p10 }
  0x5d   : > { %s280_s10 = sshll.u32 %s273_s29, 4  ;;  %s270_s14 = scalar_lea.sflag [#allocation3], %s269_s20  ;;  %s1486_s10 = int_to_ptr.vmem [resolvable:$true] %s280_s10 }
  0x5e   : > { %s1161_s8 = scalar_lea.hbm %s1480_s23, 128  ;;  %p1163_p9 = pneg %p1482_p11 }
  0x5f   : > { %p1162_p7 = scmp.ne.s32.totalorder %s1480_s23, %s1161_s8  ;;  %s1166_s21 = scalar_lea.hbm %s1623_s0, 256 }
  0x60   : > { %p1167_p1 = scmp.lt.u32.totalorder %s1480_s23, %s1623_s0  ;;  %p1168_p2 = scmp.lt.u32.totalorder %s1166_s21, %s1161_s8 }
  0x61   : > { %p1164_p12 = pnand %p1163_p9, %p1162_p7  ;;  %p1170_p8 = scmp.lt.u32.totalorder %s1161_s8, %s1480_s23 }
  0x62   : > { %p1169_p4 = por %p1168_p2, %p1167_p1 }
  0x63   : > { %p1165_p0 = pneg %p1164_p12 }
  0x64   : > { %p1171_p13 = por %p1170_p8, %p1169_p4 }
  0x66   : > { %p1172_p6 = pnand %p1171_p13, %p1165_p0 }
  0x68   : > { %1175 = shalt.err (!%p1172_p6)
}
  0x69   : > { %s1176_s20 = scalar_lea.vmem %s1486_s10, 128  ;;  %s1272_s15 = smov [#allocation2]  }
  0x6a   : > { %p1177_p10 = scmp.ne.s32.totalorder %s1486_s10, %s1176_s20  ;;  %s1181_s29 = sshll.u32 %s1272_s15, 4  ;;  %s1182_s29 = int_to_ptr.vmem [resolvable:$false] %s1181_s29 }
  0x6b   : > { %s1183_s12 = scalar_lea.vmem %s1182_s29, 256  ;;  %p1184_p12 = scmp.lt.s32.totalorder %s1486_s10, %s1182_s29 }
  0x6c   : > { %p1179_p3 = pnand %p1177_p10, %p1163_p9  ;;  %p1185_p1 = scmp.lt.s32.totalorder %s1183_s12, %s1176_s20 }
  0x6e   : > { %p1180_p7 = pneg %p1179_p3  ;;  %p1186_p2 = por %p1185_p1, %p1184_p12 }
  0x70   : > { %p1187_p4 = pnand %p1186_p2, %p1180_p7 }
  0x72   : > { %1190 = shalt.err (!%p1187_p4)
}
  0x73   : > { %1020 = dma.hbm_to_vmem [thread:$0]  (!%p1482_p11), %s1480_s23, 128, %s1486_s10, %s270_s14  }
  0x74   : > { %p1644_p0 = scmp.ne.s32.totalorder %s1638_s9, 0 }
  0x75   : > { %s1516_s8 = sand.u32 (!%p1644_p0), 1, %s1257_s25   ;;  %p1645_p9 = scmp.ne.s32.totalorder (!%p1644_p0), %s1635_s30, 0 }
  0x76   : > { %289 = sbr.rel (%p1644_p0) target bundleno = 858 (0x35a), region = 48  ;;  %s751_s17 = sshll.u32 (!%p1644_p0), %s1516_s8, 3 }
  0x77   : > { %s292_s21 = scalar_lea.sflag (!%p1644_p0), [#allocation3], %s1516_s8  ;;  %s1522_s16 = scalar_lea.vmem (!%p1644_p0), [#allocation2], %s751_s17 }
  0x7d   : > { %1236 = dma.done.wait (%p1645_p9), %s292_s21, 128  }
  0x7e   : > { %1238 = vsyncadd (%p1645_p9), %s292_s21, 4294967168  ;;  %p1646_p11 = scmp.eq.s32.totalorder %s1338_s28, 0 }
  0x80   : > { %1240 = dma.done.wait (%p1646_p11), [#allocation6], 4096   ;;  %p1647_p8 = pmov %p1646_p11 }
  0x82   : > { %1242 = vsyncadd (%p1647_p8), [#allocation6], 4294963200  ;;  %p1648_p13 = pmov %p1647_p8 }
  0x83   : > { %p1649_p6 = pmov %p1647_p8 }
  0x84   : > { %1244 = dma.done.wait (%p1648_p13), [#allocation9], 2048  }
  0x85   : > { %1246 = vsyncadd (%p1649_p6), [#allocation9], 4294965248  ;;  %v1273_v0 = vmov 0.0|0.0   ;;  %vm1274_vm0 = vmmov 0   ;;  %v1275_v1 = vmov 0.0   ;;  %v339_v2 = vld [vmem:[#allocation5] sm:$0xff] }
  0x86   : > { %919 = vmatprep.subr.bf16.mxu0 %v1273_v0  ;;  %846 = vmatprep.mubr.msk.f32.mxu0 %vm1274_vm0, %v1275_v1  ;;  %v340_v3 = vld [vmem:[#allocation5 + $0x8] sm:$0xff]  ;;  %v341_v4 = vld [vmem:[#allocation5 + $0x10] sm:$0xff]  ;;  %v342_v6 = vld [vmem:[#allocation5 + $0x18] sm:$0xff]  ;;  %s760_s13 = sshll.u32 %s1338_s28, 7  ;;  %s337_s20 = scalar_lea.vmem [#allocation10], %s751_s17 }
  0x87   : > { %943 = vmatprep.subr.bf16.mxu1 %v1273_v0  ;;  %881 = vmatprep.mubr.msk.f32.mxu1 %vm1274_vm0, %v1275_v1  ;;  %v920_v5 = vpack.c.bf16 %v340_v3, %v339_v2  ;;  %v923_v7 = vpack.c.bf16 %v342_v6, %v341_v4  ;;  %v343_v8 = vld [vmem:[#allocation5 + $0x20] sm:$0xff]  ;;  %v344_v9 = vld [vmem:[#allocation5 + $0x28] sm:$0xff]  ;;  %v439_v12 = vld [vmem:[#allocation7 + $0x10] sm:$0xff]  ;;  %s643_s15 = sshll.u32 %s337_s20, 4  ;;  %s1579_s21 = scalar_lea.hbm %s1630_s7, %s760_s13  ;;  %s1581_s15 = int_to_ptr.vmem [resolvable:$true] %s643_s15 }
  0x88   : > { %v437_v10 = vld [vmem:[#allocation7] sm:$0xff]  ;;  %v438_v11 = vld [vmem:[#allocation7 + $0x8] sm:$0xff]  ;;  %v440_v13 = vld [vmem:[#allocation7 + $0x18] sm:$0xff]  ;;  %v926_v14 = vpack.c.bf16 %v344_v9, %v343_v8  ;;  %s1191_s30 = scalar_lea.vmem %s1581_s15, 128  ;;  %s1276_s28 = smov [#allocation10]  }
  0x89   : > { %921 = vmatpush3.bf16.msra.mxu0 %v920_v5  ;;  %v944_v15 = vpack.c.bf16 %v438_v11, %v437_v10  ;;  %v345_v16 = vld [vmem:[#allocation5 + $0x30] sm:$0xff]  ;;  %v346_v17 = vld [vmem:[#allocation5 + $0x38] sm:$0xff]  ;;  %v947_v18 = vpack.c.bf16 %v440_v13, %v439_v12  ;;  %v441_v19 = vld [vmem:[#allocation7 + $0x20] sm:$0xff]  ;;  %p1192_p10 = scmp.ne.s32.totalorder %s1581_s15, %s1191_s30  ;;  %s1195_s17 = sshll.u32 %s1276_s28, 4  ;;  %s1196_s17 = int_to_ptr.vmem [resolvable:$false] %s1195_s17 }
  0x8a   : > { %922 = vmatprep.subr.bf16.mxu0 %v1273_v0  ;;  %v442_v20 = vld [vmem:[#allocation7 + $0x28] sm:$0xff]  ;;  %v929_v21 = vpack.c.bf16 %v346_v17, %v345_v16  ;;  %v347_v22 = vld [vmem:[#allocation5 + $0x40] sm:$0xff]  ;;  %v349_v26 = vld [vmem:[#allocation5 + $0x50] sm:$0xff]  ;;  %s1197_s9 = scalar_lea.vmem %s1196_s17, 256  ;;  %p1198_p12 = scmp.lt.s32.totalorder %s1581_s15, %s1196_s17 }
  0x8b   : > { %945 = vmatpush3.bf16.msra.mxu1 %v944_v15  ;;  %v348_v23 = vld [vmem:[#allocation5 + $0x48] sm:$0xff]  ;;  %v950_v24 = vpack.c.bf16 %v442_v20, %v441_v19  ;;  %v350_v27 = vld [vmem:[#allocation5 + $0x58] sm:$0xff]  ;;  %v351_v29 = vld [vmem:[#allocation5 + $0x60] sm:$0xff]  ;;  %p1193_p3 = pnand %p1192_p10, %p1471_p5  ;;  %p1199_p1 = scmp.lt.s32.totalorder %s1197_s9, %s1191_s30 }
  0x8c   : > { %946 = vmatprep.subr.bf16.mxu1 %v1273_v0  ;;  %v932_v25 = vpack.c.bf16 %v348_v23, %v347_v22  ;;  %v935_v28 = vpack.c.bf16 %v350_v27, %v349_v26  ;;  %v352_v30 = vld [vmem:[#allocation5 + $0x68] sm:$0xff]  ;;  %v353_v32 = vld [vmem:[#allocation5 + $0x70] sm:$0xff]  ;;  %v354_v33 = vld [vmem:[#allocation5 + $0x78] sm:$0xff] }
  0x8d   : > { %924 = vmatpush3.bf16.msra.mxu0 %v923_v7  ;;  %v938_v31 = vpack.c.bf16 %v352_v30, %v351_v29  ;;  %v941_v34 = vpack.c.bf16 %v354_v33, %v353_v32  ;;  %v338_v35 = vld [vmem:[%s1522_s16] sm:$0xff]  ;;  %v445_v39 = vld [vmem:[#allocation7 + $0x40] sm:$0xff]  ;;  %v446_v40 = vld [vmem:[#allocation7 + $0x48] sm:$0xff]  ;;  %s630_s16 = scalar_lea.sflag [#allocation4], %s1516_s8  ;;  %p1194_p7 = pneg %p1193_p3 }
  0x8e   : > { %925 = vmatprep.subr.bf16.mxu0 %v1273_v0  ;;  %v443_v36 = vld [vmem:[#allocation7 + $0x30] sm:$0xff]  ;;  %v444_v37 = vld [vmem:[#allocation7 + $0x38] sm:$0xff]  ;;  %v956_v41 = vpack.c.bf16 %v446_v40, %v445_v39  ;;  %v449_v45 = vld [vmem:[#allocation7 + $0x60] sm:$0xff]  ;;  %p1200_p2 = por %p1199_p1, %p1198_p12 }
  0x8f   : > { %948 = vmatpush3.bf16.msra.mxu1 %v947_v18  ;;  %v953_v38 = vpack.c.bf16 %v444_v37, %v443_v36  ;;  %v447_v42 = vld [vmem:[#allocation7 + $0x50] sm:$0xff]  ;;  %v448_v43 = vld [vmem:[#allocation7 + $0x58] sm:$0xff]  ;;  %v450_v46 = vld [vmem:[#allocation7 + $0x68] sm:$0xff] }
  0x90   : > { %949 = vmatprep.subr.bf16.mxu1 %v1273_v0  ;;  %v959_v44 = vpack.c.bf16 %v448_v43, %v447_v42  ;;  %v962_v47 = vpack.c.bf16 %v450_v46, %v449_v45  ;;  %v451_v48 = vld [vmem:[#allocation7 + $0x70] sm:$0xff]  ;;  %v452_v49 = vld [vmem:[#allocation7 + $0x78] sm:$0xff]  ;;  %v535_v51 = vld [vmem:[#allocation8] sm:$0xff]  ;;  %p1201_p4 = pnand %p1200_p2, %p1194_p7 }
  0x91   : > { %927 = vmatpush3.bf16.msra.mxu0 %v926_v14  ;;  %v965_v50 = vpack.c.bf16 %v452_v49, %v451_v48  ;;  %v536_v52 = vld [vmem:[#allocation8 + $0x8] sm:$0xff]  ;;  %v537_v53 = vld [vmem:[#allocation8 + $0x10] sm:$0xff]  ;;  %v538_v55 = vld [vmem:[#allocation8 + $0x18] sm:$0xff] }
  0x92   : > { %928 = vmatprep.subr.bf16.mxu0 %v1273_v0  ;;  %v968_v54 = vpack.c.bf16 %v536_v52, %v535_v51  ;;  %v971_v56 = vpack.c.bf16 %v538_v55, %v537_v53  ;;  %v539_v57 = vld [vmem:[#allocation8 + $0x20] sm:$0xff]  ;;  %v540_v58 = vld [vmem:[#allocation8 + $0x28] sm:$0xff]  ;;  %v756_v60 = vld [vmem:[%s1625_s2] ss:$0 sm:$0xff] }
  0x93   : > { %951 = vmatpush3.bf16.msra.mxu1 %v950_v24  ;;  %v974_v59 = vpack.c.bf16 %v540_v58, %v539_v57  ;;  %v541_v6 = vld [vmem:[#allocation8 + $0x30] sm:$0xff]  ;;  %v542_v7 = vld [vmem:[#allocation8 + $0x38] sm:$0xff]  ;;  %v543_v9 = vld [vmem:[#allocation8 + $0x40] sm:$0xff] }
  0x94   : > { %952 = vmatprep.subr.bf16.mxu1 %v1273_v0  ;;  %v977_v8 = vpack.c.bf16 %v542_v7, %v541_v6  ;;  %v544_v10 = vld [vmem:[#allocation8 + $0x48] sm:$0xff]  ;;  %v545_v12 = vld [vmem:[#allocation8 + $0x50] sm:$0xff]  ;;  %v546_v13 = vld [vmem:[#allocation8 + $0x58] sm:$0xff] }
  0x95   : > { %930 = vmatpush3.bf16.msra.mxu0 %v929_v21  ;;  %v980_v11 = vpack.c.bf16 %v544_v10, %v543_v9  ;;  %v983_v14 = vpack.c.bf16 %v546_v13, %v545_v12  ;;  %v547_v15 = vld [vmem:[#allocation8 + $0x60] sm:$0xff]  ;;  %v548_v16 = vld [vmem:[#allocation8 + $0x68] sm:$0xff]  ;;  %v549_v18 = vld [vmem:[#allocation8 + $0x70] sm:$0xff] }
  0x96   : > { %931 = vmatprep.subr.bf16.mxu0 %v1273_v0  ;;  %v986_v17 = vpack.c.bf16 %v548_v16, %v547_v15  ;;  %v550_v19 = vld [vmem:[#allocation8 + $0x78] sm:$0xff]  ;;  %v757_v21 = vld [vmem:[%s1627_s4] ss:$0 sm:$0xff] }
  0x97   : > { %954 = vmatpush3.bf16.msra.mxu1 %v953_v38  ;;  %v989_v20 = vpack.c.bf16 %v550_v19, %v549_v18  ;;  %v758_v29 = vld [vmem:[%s1629_s6] ss:$0 sm:$0xff] }
  0x98   : > { %955 = vmatprep.subr.bf16.mxu1 %v1273_v0 }
  0x99   : > { %933 = vmatpush3.bf16.msra.mxu0 %v932_v25 }
  0x9a   : > { %934 = vmatprep.subr.bf16.mxu0 %v1273_v0 }
  0x9b   : > { %957 = vmatpush3.bf16.msra.mxu1 %v956_v41 }
  0x9c   : > { %958 = vmatprep.subr.bf16.mxu1 %v1273_v0 }
  0x9d   : > { %936 = vmatpush3.bf16.msra.mxu0 %v935_v28 }
  0x9e   : > { %937 = vmatprep.subr.bf16.mxu0 %v1273_v0 }
  0x9f   : > { %960 = vmatpush3.bf16.msra.mxu1 %v959_v44 }
  0xa0   : > { %961 = vmatprep.subr.bf16.mxu1 %v1273_v0 }
  0xa1   : > { %939 = vmatpush3.bf16.msra.mxu0 %v938_v31 }
  0xa2   : > { %940 = vmatprep.subr.bf16.mxu0 %v1273_v0 }
  0xa3   : > { %963 = vmatpush3.bf16.msra.mxu1 %v962_v47 }
  0xa4   : > { %964 = vmatprep.subr.bf16.mxu1 %v1273_v0 }
  0xa5   : > { %942 = vmatpush3.bf16.msra.mxu0 %v941_v34 }
  0xa6   : > { %967 = vmatprep.subr.bf16.mxu0 %v1273_v0 }
  0xa7   : > { %966 = vmatpush3.bf16.msra.mxu1 %v965_v50 }
  0xa8   : > { %847 = vmatmul.mubr.f32.vlgmr.msra.gmra.mrb[0].mxu0 %v338_v35 }
  0xa9   : > { %916 = vmatprep.mubr.msk.f32.mxu0 %vm1274_vm0, %v1275_v1  ;;  %969 = vmatpush3.bf16.msra.mxu0 %v968_v54 }
  0xaa   : > { %970 = vmatprep.subr.bf16.mxu0 %v1273_v0 }
  0xad   : > { %972 = vmatpush3.bf16.msra.mxu0 %v971_v56 }
  0xae   : > { %973 = vmatprep.subr.bf16.mxu0 %v1273_v0 }
  0xb1   : > { %975 = vmatpush3.bf16.msra.mxu0 %v974_v59 }
  0xb2   : > { %976 = vmatprep.subr.bf16.mxu0 %v1273_v0 }
  0xb5   : > { %978 = vmatpush3.bf16.msra.mxu0 %v977_v8 }
  0xb6   : > { %979 = vmatprep.subr.bf16.mxu0 %v1273_v0 }
  0xb9   : > { %981 = vmatpush3.bf16.msra.mxu0 %v980_v11 }
  0xba   : > { %982 = vmatprep.subr.bf16.mxu0 %v1273_v0 }
  0xbd   : > { %984 = vmatpush3.bf16.msra.mxu0 %v983_v14 }
  0xbe   : > { %985 = vmatprep.subr.bf16.mxu0 %v1273_v0 }
  0xc1   : > { %987 = vmatpush3.bf16.msra.mxu0 %v986_v17 }
  0xc2   : > { %988 = vmatprep.subr.bf16.mxu0 %v1273_v0 }
  0xc5   : > { %990 = vmatpush3.bf16.msra.mxu0 %v989_v20 }
 0x17b   : > { %v428_v61 = vpop.f32.mrb[0].mxu0 }
 0x17c   : > { %v429_v62 = vadd.f32 %v756_v60, %v428_v61  ;;  %v848_v63 = vpop.f32.mrb[1].mxu0 }
 0x17e   : > { %v433_v1 = vmul.f32 0.70710677, %v429_v62  ;;  %v432_v3 = vmul.f32 0.5, %v429_v62 }
 0x180   : > { %1073 = verf.f32 %v433_v1 }
 0x18a   : > { %v1074_v2 = vpop.eup %1073 }
 0x18b   : > { %v435_v4 = vadd.f32 1.0, %v1074_v2 }
 0x18d   : > { %v436_v5 = vmul.f32 %v435_v4, %v432_v3 }
 0x18f   : > { %882 = vmatmul.mubr.f32.vlgmr.msra.gmra.mrb[0].mxu1 %v436_v5 }
 0x262   : > { %v526_v22 = vpop.f32.mrb[0].mxu1 }
 0x263   : > { %v527_v23 = vadd.f32 %v757_v21, %v526_v22  ;;  %v883_v24 = vpop.f32.mrb[1].mxu1 }
 0x265   : > { %v531_v25 = vmul.f32 0.70710677, %v527_v23  ;;  %v530_v27 = vmul.f32 0.5, %v527_v23 }
 0x267   : > { %1075 = verf.f32 %v531_v25 }
 0x271   : > { %v1076_v26 = vpop.eup %1075 }
 0x272   : > { %v533_v28 = vadd.f32 1.0, %v1076_v26 }
 0x274   : > { %v534_v0 = vmul.f32 %v533_v28, %v530_v27 }
 0x276   : > { %917 = vmatmul.mubr.f32.vlgmr.msra.gmra.mrb[2].mxu0 %v534_v0 }
 0x349   : > { %v624_v30 = vpop.f32.mrb[2].mxu0 }
 0x34a   : > { %v625_v31 = vadd.f32 %v758_v29, %v624_v30  ;;  %v918_v32 = vpop.f32.mrb[3].mxu0 }
 0x34c   : > { %628 = vst [vmem:[%s337_s20] sm:$0xff] %v625_v31 }
 0x34d   : > { %1204 = shalt.err (!%p1201_p4)
}
 0x34e   : > { %s1205_s8 = scalar_lea.hbm %s1579_s21, 128  ;;  %s1209_s11 = scalar_lea.hbm %s1630_s7, 256 }
 0x34f   : > { %p1206_p0 = scmp.ne.s32.totalorder %s1579_s21, %s1205_s8  ;;  %p1210_p8 = scmp.lt.u32.totalorder %s1579_s21, %s1630_s7 }
 0x350   : > { %p1211_p13 = scmp.lt.u32.totalorder %s1209_s11, %s1205_s8  ;;  %p1213_p10 = scmp.lt.u32.totalorder %s1205_s8, %s1579_s21 }
 0x351   : > { %p1207_p9 = pnand %p1206_p0, %p1471_p5 }
 0x352   : > { %p1212_p6 = por %p1211_p13, %p1210_p8 }
 0x353   : > { %p1208_p11 = pneg %p1207_p9 }
 0x354   : > { %p1214_p3 = por %p1213_p10, %p1212_p6 }
 0x356   : > { %p1215_p7 = pnand %p1214_p3, %p1208_p11 }
 0x358   : > { %1218 = shalt.err (!%p1215_p7)
}
 0x359   : > { %1005 = dma.vmem_to_hbm [thread:$0]  (%p1471_p5), %s1581_s15, 128, %s1579_s21, %s630_s16  }
 0x35a PF: > { %s1650_s20 = sld [smem:[#allocation15_spill]]  ;;  %s655_s29 = sand.u32 1, %s1253_s24  }
 0x35b   : > { %p1652_p1 = scmp.ge.s32.totalorder %s1265_s27, 2  ;;  %s656_s12 = scalar_lea.sflag [#allocation4], %s655_s29 }
 0x360   : > { %p1651_p12 = scmp.ne.s32.totalorder %s1650_s20, 0 }
 0x362   : > { %p1022_p2 = pnand %p1652_p1, %p1651_p12 }
 0x364   : > { %1248 = dma.done.wait (!%p1022_p2), %s656_s12, 128  }
 0x365   : > { %1250 = vsyncadd (!%p1022_p2), %s656_s12, 4294967168  ;;  %p22_p4 = scmp.ge.s32.totalorder %s1457_s22, 4   ;;  %s1653_s24 = smov %s1257_s25 }
 0x366   : > { %s1654_s25 = smov %s1261_s26  ;;  %s1655_s26 = smov %s1467_s18 }
 0x367   : > { %s1656_s27 = smov %s1457_s22  ;;  %24 = sbr.rel (!%p22_p4) target bundleno = 7 (0x7), region = 105 }
 0x36e   :  { %661 = vsyncpa [#allocation3], 1 }
 0x36f   :  { %663 = vsyncpa [#allocation3 + $0x1], 1 }
 0x370   :  { %664 = vsyncpa [#allocation6], 1 }
 0x371   :  { %665 = vsyncpa [#allocation9], 1 }
 0x372   :  { %666 = vsyncpa [#allocation4], 1 }
 0x373   :  { %668 = vsyncpa [#allocation4 + $0x1], 1 }

// kernel: tpu_custom_call.1
= control target key start
LH: loop header
LB: loop body
LE: loop exit
PB: predicated region body
PF: predicated region fallthrough
CT: control target
= control target key end

     0   :  { %12 = vsyncpa [#allocation3], 0  ;;  %s1623_s0 = inlined_call_operand.hbm [shape: f32[16,128], index: 0, kind: input, shape index: {}]   ;;  %s1624_s1 = inlined_call_operand.hbm [shape: f32[128,128], index: 1, kind: input, shape index: {}]   ;;  %s1625_s2 = inlined_call_operand.vmem [shape: f32[1,128], index: 2, kind: input, shape index: {}]   ;;  %s1626_s3 = inlined_call_operand.hbm [shape: f32[128,128], index: 3, kind: input, shape index: {}]   ;;  %s1627_s4 = inlined_call_operand.vmem [shape: f32[1,128], index: 4, kind: input, shape index: {}]   ;;  %s1628_s5 = inlined_call_operand.hbm [shape: f32[128,128], index: 5, kind: input, shape index: {}]   ;;  %s1629_s6 = inlined_call_operand.vmem [shape: f32[1,128], index: 6, kind: input, shape index: {}]   ;;  %s1630_s7 = inlined_call_operand.hbm [shape: f32[16,128], index: 7, kind: output, shape index: {}]  }
   0x1   :  { %14 = vsyncpa [#allocation3 + $0x1], 0 }
   0x2   :  { %15 = vsyncpa [#allocation6], 0 }
   0x3   :  { %16 = vsyncpa [#allocation9], 0 }
   0x4   :  { %17 = vsyncpa [#allocation4], 0 }
   0x5   :  { %19 = vsyncpa [#allocation4 + $0x1], 0  ;;  %s1317_s24 = smov 0   ;;  %s1319_s25 = smov 0  }
   0x6   :  { %s1321_s26 = smov 0   ;;  %s1323_s27 = smov 0  }
   0x7 LB: > { %s1338_s28 = sadd.s32 4294967295, %s1265_s27   ;;  %s742_s29 = sadd.s32 4294967294, %s1265_s27   ;;  %s1265_s27 = sphi %s1323_s27, %s1656_s27   ;;  %s1261_s26 = sphi %s1321_s26, %s1655_s26   ;;  %s1257_s25 = sphi %s1319_s25, %s1654_s25   ;;  %s1253_s24 = sphi %s1317_s24, %s1653_s24  }
   0x8   : > { %p45_p0 = scmp.ne.s32.totalorder %s1257_s25, %s1253_s24  ;;  %p1631_p1 = scmp.eq.s32.totalorder %s1338_s28, 0 }
   0x9   : > { %p201_p3 = scmp.eq.s32.totalorder %s742_s29, 1  ;;  %p743_p5 = scmp.ge.s32.totalorder %s1265_s27, 1 }
   0xa   : > { %p1347_p4 = por %p1631_p1, %p45_p0  ;;  %p208_p7 = scmp.lt.s32.totalorder %s1265_s27, 3 }
   0xb   : > { %p1352_p6 = por %p201_p3, %p45_p0  ;;  %s1267_s10 = smov [#allocation5]  }
   0xc   : > { %s1635_s30 = scalar_select %p1347_p4, 1, 0 }
   0xd   : > { %s1636_s8 = scalar_select %p1352_p6, 1, 0 }
   0xe   : > { %p1357_p8 = pnand %p743_p5, %p208_p7  ;;  %s220_s11 = sshll.u32 %s1267_s10, 4  ;;  %s1361_s11 = int_to_ptr.vmem [resolvable:$true] %s220_s11 }
   0xf   : > { %1637 = sst [smem:[#allocation15_spill]] %s1636_s8  ;;  %s1268_s13 = smov [#allocation7]  }
  0x10   : > { %s1638_s9 = scalar_select %p1357_p8, 1, 0 }
  0x11   : > { %p1007_p9 = pneg %p1357_p8  ;;  %s236_s14 = sshll.u32 %s1268_s13, 4  ;;  %s1372_s14 = int_to_ptr.vmem [resolvable:$true] %s236_s14 }
  0x12   : > { %s1269_s15 = smov [#allocation8]   ;;  %s1077_s19 = scalar_lea.hbm %s1624_s1, 2048 }
  0x13   : > { %p1368_p11 = pnand %p1007_p9, %p1631_p1  ;;  %s1374_s16 = sshll.u32 %s1269_s15, 4  ;;  %s253_s16 = int_to_ptr.vmem [resolvable:$true] %s1374_s16 }
  0x14   : > { %p1078_p12 = scmp.ne.s32.totalorder %s1624_s1, %s1077_s19  ;;  %p1084_p5 = scmp.lt.u32.totalorder %s1077_s19, %s1624_s1 }
  0x15   : > { %p1384_p13 = pneg %p1368_p11 }
  0x17   : > { %p1080_p0 = pnand %p1384_p13, %p1078_p12 }
  0x19   : > { %p1081_p3 = pneg %p1080_p0 }
  0x1b   : > { %p1086_p7 = pnand %p1084_p5, %p1081_p3 }
  0x1d   : > { %1089 = shalt.err (!%p1086_p7)
}
  0x1e   : > { %s1090_s10 = scalar_lea.vmem %s1361_s11, 2048  ;;  %p1098_p2 = scmp.lt.s32.totalorder %s1361_s11, %s1361_s11 }
  0x1f   : > { %p1091_p9 = scmp.ne.s32.totalorder %s1361_s11, %s1090_s10  ;;  %p1099_p6 = scmp.lt.s32.totalorder %s1090_s10, %s1090_s10 }
  0x21   : > { %p1093_p10 = pnand %p1091_p9, %p1384_p13  ;;  %p1100_p12 = por %p1099_p6, %p1098_p2 }
  0x23   : > { %p1094_p1 = pneg %p1093_p10 }
  0x25   : > { %p1101_p0 = pnand %p1100_p12, %p1094_p1 }
  0x27   : > { %1104 = shalt.err (!%p1101_p0)
}
  0x28   : > { %s1270_s13 = smov 128   ;;  %s1271_s15 = smov 8  }
  0x29   : > { %1010 = dma.hbm_to_vmem [thread:$0]  (!%p1368_p11), %s1624_s1, 2048, %s1361_s11, [#allocation6], %s1270_s13, %s1270_s13, %s1271_s15  }
  0x2a   : > { %s1105_s21 = scalar_lea.hbm %s1626_s3, 2048 }
  0x2b   : > { %p1106_p1 = scmp.ne.s32.totalorder %s1626_s3, %s1105_s21  ;;  %p1112_p10 = scmp.lt.u32.totalorder %s1105_s21, %s1626_s3 }
  0x2d   : > { %p1108_p2 = pnand %p1106_p1, %p1384_p13 }
  0x2f   : > { %p1109_p6 = pneg %p1108_p2 }
  0x31   : > { %p1114_p3 = pnand %p1112_p10, %p1109_p6 }
  0x33   : > { %1117 = shalt.err (!%p1114_p3)
}
  0x34   : > { %s1118_s11 = scalar_lea.vmem %s1372_s14, 2048  ;;  %p1126_p12 = scmp.lt.s32.totalorder %s1372_s14, %s1372_s14 }
  0x35   : > { %p1119_p5 = scmp.ne.s32.totalorder %s1372_s14, %s1118_s11  ;;  %p1127_p0 = scmp.lt.s32.totalorder %s1118_s11, %s1118_s11 }
  0x37   : > { %p1121_p7 = pnand %p1119_p5, %p1384_p13  ;;  %p1128_p1 = por %p1127_p0, %p1126_p12 }
  0x39   : > { %p1122_p9 = pneg %p1121_p7 }
  0x3b   : > { %p1129_p2 = pnand %p1128_p1, %p1122_p9 }
  0x3d   : > { %1132 = shalt.err (!%p1129_p2)
}
  0x3e   : > { %1013 = dma.hbm_to_vmem [thread:$0]  (!%p1368_p11), %s1626_s3, 2048, %s1372_s14, [#allocation6], %s1270_s13, %s1270_s13, %s1271_s15  }
  0x3f   : > { %s1133_s20 = scalar_lea.hbm %s1628_s5, 2048 }
  0x40   : > { %p1134_p6 = scmp.ne.s32.totalorder %s1628_s5, %s1133_s20  ;;  %p1140_p5 = scmp.lt.u32.totalorder %s1133_s20, %s1628_s5 }
  0x42   : > { %p1136_p10 = pnand %p1134_p6, %p1384_p13 }
  0x44   : > { %p1137_p3 = pneg %p1136_p10 }
  0x46   : > { %p1142_p7 = pnand %p1140_p5, %p1137_p3 }
  0x48   : > { %1145 = shalt.err (!%p1142_p7)
}
  0x49   : > { %s1146_s11 = scalar_lea.vmem %s253_s16, 2048  ;;  %p1154_p1 = scmp.lt.s32.totalorder %s253_s16, %s253_s16 }
  0x4a   : > { %p1147_p9 = scmp.ne.s32.totalorder %s253_s16, %s1146_s11  ;;  %p1155_p2 = scmp.lt.s32.totalorder %s1146_s11, %s1146_s11 }
  0x4c   : > { %p1149_p12 = pnand %p1147_p9, %p1384_p13  ;;  %p1156_p4 = por %p1155_p2, %p1154_p1 }
  0x4e   : > { %p1150_p0 = pneg %p1149_p12 }
  0x50   : > { %p1157_p8 = pnand %p1156_p4, %p1150_p0 }
  0x52   : > { %1160 = shalt.err (!%p1157_p8)
}
  0x53   : > { %1016 = dma.hbm_to_vmem [thread:$0]  (!%p1368_p11), %s1628_s5, 2048, %s253_s16, [#allocation9], %s1270_s13, %s1270_s13, %s1271_s15  }
  0x54   : > { %s1457_s22 = sadd.s32 1, %s1265_s27   ;;  %s32_s17 = sadd.s32 1, %s1261_s26 }
  0x55   : > { %s29_s12 = ssub.s32 %s1265_s27, %s1457_s22  ;;  %p39_p8 = scmp.ne.s32.totalorder %s1261_s26, %s1257_s25 }
  0x56   : > { %p30_p4 = scmp.eq.s32.totalorder %s29_s12, 0  ;;  %p40_p13 = scmp.eq.s32.totalorder %s1265_s27, 0 }
  0x57   : > { %p1028_p6 = scmp.lt.s32.totalorder %s1265_s27, 2  ;;  %p1641_p3 = scmp.eq.s32.totalorder %s1338_s28, 1 }
  0x58   : > { %s1467_s18 = scalar_select %p30_p4, %s1261_s26, %s32_s17  }
  0x59   : > { %p41_p10 = por %p40_p13, %p39_p8  ;;  %p1471_p5 = por %p1641_p3, %p39_p8 }
  0x5a   : > { %s269_s20 = sand.u32 1, %s1261_s26   ;;  %s749_s21 = sshll.u32 %s1265_s27, 7 }
  0x5b   : > { %s748_s16 = sshll.u32 %s269_s20, 3  ;;  %s1480_s23 = scalar_lea.hbm %s1623_s0, %s749_s21 }
  0x5c   : > { %s273_s29 = scalar_lea.vmem [#allocation2], %s748_s16  ;;  %p1482_p11 = pnand %p1028_p6, %p41_p10 }
  0x5d   : > { %s280_s10 = sshll.u32 %s273_s29, 4  ;;  %s270_s14 = scalar_lea.sflag [#allocation3], %s269_s20  ;;  %s1486_s10 = int_to_ptr.vmem [resolvable:$true] %s280_s10 }
  0x5e   : > { %s1161_s8 = scalar_lea.hbm %s1480_s23, 128  ;;  %p1163_p9 = pneg %p1482_p11 }
  0x5f   : > { %p1162_p7 = scmp.ne.s32.totalorder %s1480_s23, %s1161_s8  ;;  %s1166_s21 = scalar_lea.hbm %s1623_s0, 256 }
  0x60   : > { %p1167_p1 = scmp.lt.u32.totalorder %s1480_s23, %s1623_s0  ;;  %p1168_p2 = scmp.lt.u32.totalorder %s1166_s21, %s1161_s8 }
  0x61   : > { %p1164_p12 = pnand %p1163_p9, %p1162_p7  ;;  %p1170_p8 = scmp.lt.u32.totalorder %s1161_s8, %s1480_s23 }
  0x62   : > { %p1169_p4 = por %p1168_p2, %p1167_p1 }
  0x63   : > { %p1165_p0 = pneg %p1164_p12 }
  0x64   : > { %p1171_p13 = por %p1170_p8, %p1169_p4 }
  0x66   : > { %p1172_p6 = pnand %p1171_p13, %p1165_p0 }
  0x68   : > { %1175 = shalt.err (!%p1172_p6)
}
  0x69   : > { %s1176_s20 = scalar_lea.vmem %s1486_s10, 128  ;;  %s1272_s15 = smov [#allocation2]  }
  0x6a   : > { %p1177_p10 = scmp.ne.s32.totalorder %s1486_s10, %s1176_s20  ;;  %s1181_s29 = sshll.u32 %s1272_s15, 4  ;;  %s1182_s29 = int_to_ptr.vmem [resolvable:$false] %s1181_s29 }
  0x6b   : > { %s1183_s12 = scalar_lea.vmem %s1182_s29, 256  ;;  %p1184_p12 = scmp.lt.s32.totalorder %s1486_s10, %s1182_s29 }
  0x6c   : > { %p1179_p3 = pnand %p1177_p10, %p1163_p9  ;;  %p1185_p1 = scmp.lt.s32.totalorder %s1183_s12, %s1176_s20 }
  0x6e   : > { %p1180_p7 = pneg %p1179_p3  ;;  %p1186_p2 = por %p1185_p1, %p1184_p12 }
  0x70   : > { %p1187_p4 = pnand %p1186_p2, %p1180_p7 }
  0x72   : > { %1190 = shalt.err (!%p1187_p4)
}
  0x73   : > { %1020 = dma.hbm_to_vmem [thread:$0]  (!%p1482_p11), %s1480_s23, 128, %s1486_s10, %s270_s14  }
  0x74   : > { %p1644_p0 = scmp.ne.s32.totalorder %s1638_s9, 0 }
  0x75   : > { %s1516_s8 = sand.u32 (!%p1644_p0), 1, %s1257_s25   ;;  %p1645_p9 = scmp.ne.s32.totalorder (!%p1644_p0), %s1635_s30, 0 }
  0x76   : > { %289 = sbr.rel (%p1644_p0) target bundleno = 858 (0x35a), region = 48  ;;  %s751_s17 = sshll.u32 (!%p1644_p0), %s1516_s8, 3 }
  0x77   : > { %s292_s21 = scalar_lea.sflag (!%p1644_p0), [#allocation3], %s1516_s8  ;;  %s1522_s16 = scalar_lea.vmem (!%p1644_p0), [#allocation2], %s751_s17 }
  0x7d   : > { %1236 = dma.done.wait (%p1645_p9), %s292_s21, 128  }
  0x7e   : > { %1238 = vsyncadd (%p1645_p9), %s292_s21, 4294967168  ;;  %p1646_p11 = scmp.eq.s32.totalorder %s1338_s28, 0 }
  0x80   : > { %1240 = dma.done.wait (%p1646_p11), [#allocation6], 4096   ;;  %p1647_p8 = pmov %p1646_p11 }
  0x82   : > { %1242 = vsyncadd (%p1647_p8), [#allocation6], 4294963200  ;;  %p1648_p13 = pmov %p1647_p8 }
  0x83   : > { %p1649_p6 = pmov %p1647_p8 }
  0x84   : > { %1244 = dma.done.wait (%p1648_p13), [#allocation9], 2048  }
  0x85   : > { %1246 = vsyncadd (%p1649_p6), [#allocation9], 4294965248  ;;  %v1273_v0 = vmov 0.0|0.0   ;;  %vm1274_vm0 = vmmov 0   ;;  %v1275_v1 = vmov 0.0   ;;  %v339_v2 = vld [vmem:[#allocation5] sm:$0xff] }
  0x86   : > { %919 = vmatprep.subr.bf16.mxu0 %v1273_v0  ;;  %846 = vmatprep.mubr.msk.f32.mxu0 %vm1274_vm0, %v1275_v1  ;;  %v340_v3 = vld [vmem:[#allocation5 + $0x8] sm:$0xff]  ;;  %v341_v4 = vld [vmem:[#allocation5 + $0x10] sm:$0xff]  ;;  %v342_v6 = vld [vmem:[#allocation5 + $0x18] sm:$0xff]  ;;  %s760_s13 = sshll.u32 %s1338_s28, 7  ;;  %s337_s20 = scalar_lea.vmem [#allocation10], %s751_s17 }
  0x87   : > { %943 = vmatprep.subr.bf16.mxu1 %v1273_v0  ;;  %881 = vmatprep.mubr.msk.f32.mxu1 %vm1274_vm0, %v1275_v1  ;;  %v920_v5 = vpack.c.bf16 %v340_v3, %v339_v2  ;;  %v923_v7 = vpack.c.bf16 %v342_v6, %v341_v4  ;;  %v343_v8 = vld [vmem:[#allocation5 + $0x20] sm:$0xff]  ;;  %v344_v9 = vld [vmem:[#allocation5 + $0x28] sm:$0xff]  ;;  %v439_v12 = vld [vmem:[#allocation7 + $0x10] sm:$0xff]  ;;  %s643_s15 = sshll.u32 %s337_s20, 4  ;;  %s1579_s21 = scalar_lea.hbm %s1630_s7, %s760_s13  ;;  %s1581_s15 = int_to_ptr.vmem [resolvable:$true] %s643_s15 }
  0x88   : > { %v437_v10 = vld [vmem:[#allocation7] sm:$0xff]  ;;  %v438_v11 = vld [vmem:[#allocation7 + $0x8] sm:$0xff]  ;;  %v440_v13 = vld [vmem:[#allocation7 + $0x18] sm:$0xff]  ;;  %v926_v14 = vpack.c.bf16 %v344_v9, %v343_v8  ;;  %s1191_s30 = scalar_lea.vmem %s1581_s15, 128  ;;  %s1276_s28 = smov [#allocation10]  }
  0x89   : > { %921 = vmatpush3.bf16.msra.mxu0 %v920_v5  ;;  %v944_v15 = vpack.c.bf16 %v438_v11, %v437_v10  ;;  %v345_v16 = vld [vmem:[#allocation5 + $0x30] sm:$0xff]  ;;  %v346_v17 = vld [vmem:[#allocation5 + $0x38] sm:$0xff]  ;;  %v947_v18 = vpack.c.bf16 %v440_v13, %v439_v12  ;;  %v441_v19 = vld [vmem:[#allocation7 + $0x20] sm:$0xff]  ;;  %p1192_p10 = scmp.ne.s32.totalorder %s1581_s15, %s1191_s30  ;;  %s1195_s17 = sshll.u32 %s1276_s28, 4  ;;  %s1196_s17 = int_to_ptr.vmem [resolvable:$false] %s1195_s17 }
  0x8a   : > { %922 = vmatprep.subr.bf16.mxu0 %v1273_v0  ;;  %v442_v20 = vld [vmem:[#allocation7 + $0x28] sm:$0xff]  ;;  %v929_v21 = vpack.c.bf16 %v346_v17, %v345_v16  ;;  %v347_v22 = vld [vmem:[#allocation5 + $0x40] sm:$0xff]  ;;  %v349_v26 = vld [vmem:[#allocation5 + $0x50] sm:$0xff]  ;;  %s1197_s9 = scalar_lea.vmem %s1196_s17, 256  ;;  %p1198_p12 = scmp.lt.s32.totalorder %s1581_s15, %s1196_s17 }
  0x8b   : > { %945 = vmatpush3.bf16.msra.mxu1 %v944_v15  ;;  %v348_v23 = vld [vmem:[#allocation5 + $0x48] sm:$0xff]  ;;  %v950_v24 = vpack.c.bf16 %v442_v20, %v441_v19  ;;  %v350_v27 = vld [vmem:[#allocation5 + $0x58] sm:$0xff]  ;;  %v351_v29 = vld [vmem:[#allocation5 + $0x60] sm:$0xff]  ;;  %p1193_p3 = pnand %p1192_p10, %p1471_p5  ;;  %p1199_p1 = scmp.lt.s32.totalorder %s1197_s9, %s1191_s30 }
  0x8c   : > { %946 = vmatprep.subr.bf16.mxu1 %v1273_v0  ;;  %v932_v25 = vpack.c.bf16 %v348_v23, %v347_v22  ;;  %v935_v28 = vpack.c.bf16 %v350_v27, %v349_v26  ;;  %v352_v30 = vld [vmem:[#allocation5 + $0x68] sm:$0xff]  ;;  %v353_v32 = vld [vmem:[#allocation5 + $0x70] sm:$0xff]  ;;  %v354_v33 = vld [vmem:[#allocation5 + $0x78] sm:$0xff] }
  0x8d   : > { %924 = vmatpush3.bf16.msra.mxu0 %v923_v7  ;;  %v938_v31 = vpack.c.bf16 %v352_v30, %v351_v29  ;;  %v941_v34 = vpack.c.bf16 %v354_v33, %v353_v32  ;;  %v338_v35 = vld [vmem:[%s1522_s16] sm:$0xff]  ;;  %v445_v39 = vld [vmem:[#allocation7 + $0x40] sm:$0xff]  ;;  %v446_v40 = vld [vmem:[#allocation7 + $0x48] sm:$0xff]  ;;  %s630_s16 = scalar_lea.sflag [#allocation4], %s1516_s8  ;;  %p1194_p7 = pneg %p1193_p3 }
  0x8e   : > { %925 = vmatprep.subr.bf16.mxu0 %v1273_v0  ;;  %v443_v36 = vld [vmem:[#allocation7 + $0x30] sm:$0xff]  ;;  %v444_v37 = vld [vmem:[#allocation7 + $0x38] sm:$0xff]  ;;  %v956_v41 = vpack.c.bf16 %v446_v40, %v445_v39  ;;  %v449_v45 = vld [vmem:[#allocation7 + $0x60] sm:$0xff]  ;;  %p1200_p2 = por %p1199_p1, %p1198_p12 }
  0x8f   : > { %948 = vmatpush3.bf16.msra.mxu1 %v947_v18  ;;  %v953_v38 = vpack.c.bf16 %v444_v37, %v443_v36  ;;  %v447_v42 = vld [vmem:[#allocation7 + $0x50] sm:$0xff]  ;;  %v448_v43 = vld [vmem:[#allocation7 + $0x58] sm:$0xff]  ;;  %v450_v46 = vld [vmem:[#allocation7 + $0x68] sm:$0xff] }
  0x90   : > { %949 = vmatprep.subr.bf16.mxu1 %v1273_v0  ;;  %v959_v44 = vpack.c.bf16 %v448_v43, %v447_v42  ;;  %v962_v47 = vpack.c.bf16 %v450_v46, %v449_v45  ;;  %v451_v48 = vld [vmem:[#allocation7 + $0x70] sm:$0xff]  ;;  %v452_v49 = vld [vmem:[#allocation7 + $0x78] sm:$0xff]  ;;  %v535_v51 = vld [vmem:[#allocation8] sm:$0xff]  ;;  %p1201_p4 = pnand %p1200_p2, %p1194_p7 }
  0x91   : > { %927 = vmatpush3.bf16.msra.mxu0 %v926_v14  ;;  %v965_v50 = vpack.c.bf16 %v452_v49, %v451_v48  ;;  %v536_v52 = vld [vmem:[#allocation8 + $0x8] sm:$0xff]  ;;  %v537_v53 = vld [vmem:[#allocation8 + $0x10] sm:$0xff]  ;;  %v538_v55 = vld [vmem:[#allocation8 + $0x18] sm:$0xff] }
  0x92   : > { %928 = vmatprep.subr.bf16.mxu0 %v1273_v0  ;;  %v968_v54 = vpack.c.bf16 %v536_v52, %v535_v51  ;;  %v971_v56 = vpack.c.bf16 %v538_v55, %v537_v53  ;;  %v539_v57 = vld [vmem:[#allocation8 + $0x20] sm:$0xff]  ;;  %v540_v58 = vld [vmem:[#allocation8 + $0x28] sm:$0xff]  ;;  %v756_v60 = vld [vmem:[%s1625_s2] ss:$0 sm:$0xff] }
  0x93   : > { %951 = vmatpush3.bf16.msra.mxu1 %v950_v24  ;;  %v974_v59 = vpack.c.bf16 %v540_v58, %v539_v57  ;;  %v541_v6 = vld [vmem:[#allocation8 + $0x30] sm:$0xff]  ;;  %v542_v7 = vld [vmem:[#allocation8 + $0x38] sm:$0xff]  ;;  %v543_v9 = vld [vmem:[#allocation8 + $0x40] sm:$0xff] }
  0x94   : > { %952 = vmatprep.subr.bf16.mxu1 %v1273_v0  ;;  %v977_v8 = vpack.c.bf16 %v542_v7, %v541_v6  ;;  %v544_v10 = vld [vmem:[#allocation8 + $0x48] sm:$0xff]  ;;  %v545_v12 = vld [vmem:[#allocation8 + $0x50] sm:$0xff]  ;;  %v546_v13 = vld [vmem:[#allocation8 + $0x58] sm:$0xff] }
  0x95   : > { %930 = vmatpush3.bf16.msra.mxu0 %v929_v21  ;;  %v980_v11 = vpack.c.bf16 %v544_v10, %v543_v9  ;;  %v983_v14 = vpack.c.bf16 %v546_v13, %v545_v12  ;;  %v547_v15 = vld [vmem:[#allocation8 + $0x60] sm:$0xff]  ;;  %v548_v16 = vld [vmem:[#allocation8 + $0x68] sm:$0xff]  ;;  %v549_v18 = vld [vmem:[#allocation8 + $0x70] sm:$0xff] }
  0x96   : > { %931 = vmatprep.subr.bf16.mxu0 %v1273_v0  ;;  %v986_v17 = vpack.c.bf16 %v548_v16, %v547_v15  ;;  %v550_v19 = vld [vmem:[#allocation8 + $0x78] sm:$0xff]  ;;  %v757_v21 = vld [vmem:[%s1627_s4] ss:$0 sm:$0xff] }
  0x97   : > { %954 = vmatpush3.bf16.msra.mxu1 %v953_v38  ;;  %v989_v20 = vpack.c.bf16 %v550_v19, %v549_v18  ;;  %v758_v29 = vld [vmem:[%s1629_s6] ss:$0 sm:$0xff] }
  0x98   : > { %955 = vmatprep.subr.bf16.mxu1 %v1273_v0 }
  0x99   : > { %933 = vmatpush3.bf16.msra.mxu0 %v932_v25 }
  0x9a   : > { %934 = vmatprep.subr.bf16.mxu0 %v1273_v0 }
  0x9b   : > { %957 = vmatpush3.bf16.msra.mxu1 %v956_v41 }
  0x9c   : > { %958 = vmatprep.subr.bf16.mxu1 %v1273_v0 }
  0x9d   : > { %936 = vmatpush3.bf16.msra.mxu0 %v935_v28 }
  0x9e   : > { %937 = vmatprep.subr.bf16.mxu0 %v1273_v0 }
  0x9f   : > { %960 = vmatpush3.bf16.msra.mxu1 %v959_v44 }
  0xa0   : > { %961 = vmatprep.subr.bf16.mxu1 %v1273_v0 }
  0xa1   : > { %939 = vmatpush3.bf16.msra.mxu0 %v938_v31 }
  0xa2   : > { %940 = vmatprep.subr.bf16.mxu0 %v1273_v0 }
  0xa3   : > { %963 = vmatpush3.bf16.msra.mxu1 %v962_v47 }
  0xa4   : > { %964 = vmatprep.subr.bf16.mxu1 %v1273_v0 }
  0xa5   : > { %942 = vmatpush3.bf16.msra.mxu0 %v941_v34 }
  0xa6   : > { %967 = vmatprep.subr.bf16.mxu0 %v1273_v0 }
  0xa7   : > { %966 = vmatpush3.bf16.msra.mxu1 %v965_v50 }
  0xa8   : > { %847 = vmatmul.mubr.f32.vlgmr.msra.gmra.mrb[0].mxu0 %v338_v35 }
  0xa9   : > { %916 = vmatprep.mubr.msk.f32.mxu0 %vm1274_vm0, %v1275_v1  ;;  %969 = vmatpush3.bf16.msra.mxu0 %v968_v54 }
  0xaa   : > { %970 = vmatprep.subr.bf16.mxu0 %v1273_v0 }
  0xad   : > { %972 = vmatpush3.bf16.msra.mxu0 %v971_v56 }
  0xae   : > { %973 = vmatprep.subr.bf16.mxu0 %v1273_v0 }
  0xb1   : > { %975 = vmatpush3.bf16.msra.mxu0 %v974_v59 }
  0xb2   : > { %976 = vmatprep.subr.bf16.mxu0 %v1273_v0 }
  0xb5   : > { %978 = vmatpush3.bf16.msra.mxu0 %v977_v8 }
  0xb6   : > { %979 = vmatprep.subr.bf16.mxu0 %v1273_v0 }
  0xb9   : > { %981 = vmatpush3.bf16.msra.mxu0 %v980_v11 }
  0xba   : > { %982 = vmatprep.subr.bf16.mxu0 %v1273_v0 }
  0xbd   : > { %984 = vmatpush3.bf16.msra.mxu0 %v983_v14 }
  0xbe   : > { %985 = vmatprep.subr.bf16.mxu0 %v1273_v0 }
  0xc1   : > { %987 = vmatpush3.bf16.msra.mxu0 %v986_v17 }
  0xc2   : > { %988 = vmatprep.subr.bf16.mxu0 %v1273_v0 }
  0xc5   : > { %990 = vmatpush3.bf16.msra.mxu0 %v989_v20 }
 0x17b   : > { %v428_v61 = vpop.f32.mrb[0].mxu0 }
 0x17c   : > { %v429_v62 = vadd.f32 %v756_v60, %v428_v61  ;;  %v848_v63 = vpop.f32.mrb[1].mxu0 }
 0x17e   : > { %v433_v1 = vmul.f32 0.70710677, %v429_v62  ;;  %v432_v3 = vmul.f32 0.5, %v429_v62 }
 0x180   : > { %1073 = verf.f32 %v433_v1 }
 0x18a   : > { %v1074_v2 = vpop.eup %1073 }
 0x18b   : > { %v435_v4 = vadd.f32 1.0, %v1074_v2 }
 0x18d   : > { %v436_v5 = vmul.f32 %v435_v4, %v432_v3 }
 0x18f   : > { %882 = vmatmul.mubr.f32.vlgmr.msra.gmra.mrb[0].mxu1 %v436_v5 }
 0x262   : > { %v526_v22 = vpop.f32.mrb[0].mxu1 }
 0x263   : > { %v527_v23 = vadd.f32 %v757_v21, %v526_v22  ;;  %v883_v24 = vpop.f32.mrb[1].mxu1 }
 0x265   : > { %v531_v25 = vmul.f32 0.70710677, %v527_v23  ;;  %v530_v27 = vmul.f32 0.5, %v527_v23 }
 0x267   : > { %1075 = verf.f32 %v531_v25 }
 0x271   : > { %v1076_v26 = vpop.eup %1075 }
 0x272   : > { %v533_v28 = vadd.f32 1.0, %v1076_v26 }
 0x274   : > { %v534_v0 = vmul.f32 %v533_v28, %v530_v27 }
 0x276   : > { %917 = vmatmul.mubr.f32.vlgmr.msra.gmra.mrb[2].mxu0 %v534_v0 }
 0x349   : > { %v624_v30 = vpop.f32.mrb[2].mxu0 }
 0x34a   : > { %v625_v31 = vadd.f32 %v758_v29, %v624_v30  ;;  %v918_v32 = vpop.f32.mrb[3].mxu0 }
 0x34c   : > { %628 = vst [vmem:[%s337_s20] sm:$0xff] %v625_v31 }
 0x34d   : > { %1204 = shalt.err (!%p1201_p4)
}
 0x34e   : > { %s1205_s8 = scalar_lea.hbm %s1579_s21, 128  ;;  %s1209_s11 = scalar_lea.hbm %s1630_s7, 256 }
 0x34f   : > { %p1206_p0 = scmp.ne.s32.totalorder %s1579_s21, %s1205_s8  ;;  %p1210_p8 = scmp.lt.u32.totalorder %s1579_s21, %s1630_s7 }
 0x350   : > { %p1211_p13 = scmp.lt.u32.totalorder %s1209_s11, %s1205_s8  ;;  %p1213_p10 = scmp.lt.u32.totalorder %s1205_s8, %s1579_s21 }
 0x351   : > { %p1207_p9 = pnand %p1206_p0, %p1471_p5 }
 0x352   : > { %p1212_p6 = por %p1211_p13, %p1210_p8 }
 0x353   : > { %p1208_p11 = pneg %p1207_p9 }
 0x354   : > { %p1214_p3 = por %p1213_p10, %p1212_p6 }
 0x356   : > { %p1215_p7 = pnand %p1214_p3, %p1208_p11 }
 0x358   : > { %1218 = shalt.err (!%p1215_p7)
}
 0x359   : > { %1005 = dma.vmem_to_hbm [thread:$0]  (%p1471_p5), %s1581_s15, 128, %s1579_s21, %s630_s16  }
 0x35a PF: > { %s1650_s20 = sld [smem:[#allocation15_spill]]  ;;  %s655_s29 = sand.u32 1, %s1253_s24  }
 0x35b   : > { %p1652_p1 = scmp.ge.s32.totalorder %s1265_s27, 2  ;;  %s656_s12 = scalar_lea.sflag [#allocation4], %s655_s29 }
 0x360   : > { %p1651_p12 = scmp.ne.s32.totalorder %s1650_s20, 0 }
 0x362   : > { %p1022_p2 = pnand %p1652_p1, %p1651_p12 }
 0x364   : > { %1248 = dma.done.wait (!%p1022_p2), %s656_s12, 128  }
 0x365   : > { %1250 = vsyncadd (!%p1022_p2), %s656_s12, 4294967168  ;;  %p22_p4 = scmp.ge.s32.totalorder %s1457_s22, 4   ;;  %s1653_s24 = smov %s1257_s25 }
 0x366   : > { %s1654_s25 = smov %s1261_s26  ;;  %s1655_s26 = smov %s1467_s18 }
 0x367   : > { %s1656_s27 = smov %s1457_s22  ;;  %24 = sbr.rel (!%p22_p4) target bundleno = 7 (0x7), region = 105 }
 0x36e   :  { %661 = vsyncpa [#allocation3], 1 }
 0x36f   :  { %663 = vsyncpa [#allocation3 + $0x1], 1 }
 0x370   :  { %664 = vsyncpa [#allocation6], 1 }
 0x371   :  { %665 = vsyncpa [#allocation9], 1 }
 0x372   :  { %666 = vsyncpa [#allocation4], 1 }
 0x373   :  { %668 = vsyncpa [#allocation4 + $0x1], 1 }

</bundles_post_ra>
